<compile_context>
chip_gen: v7x
topology: tpu7x:2x2x1
jax: 0.10.0
libtpu: 0.0.40
codegen_flags: <defaults>
</compile_context>

<pallas_src>
import functools
import numpy as np
import jax
import jax.numpy as jnp
from jax.experimental import pallas as pl
from jax.experimental.pallas import tpu as pltpu

DIM = 128        # MoCo head output dim
K = 256          # queue size (small for the demo; torch default 2048)
FEAT = 128       # backbone feature_size (stand-in for s3d's 1024)
C_IN = 3         # video channels
T_SOFTMAX = 0.07
TOPK = 5

_NEG_SENTINEL = -3.0   # < -1 (sims are dots of unit vectors): finite stand-in for -inf


def _vmem_spec():
    return pl.BlockSpec(memory_space=pltpu.MemorySpace.VMEM)


# ----------------------------------------------------------------------------
# Fused CoCLR forward kernel.
#   heads: backbone-stand-in -> AdaptiveAvgPool3d((1,1,1)) -> Conv3d(F,F,1)+b ->
#          ReLU -> Conv3d(F,dim,1)+b -> F.normalize(dim=1)
#   then:  l_pos, l_neg, positive mask (incl. top-k mining vs queue_second).
# TODO(synk): the real S3D backbone (select_backbone) is not provided; a 1x1x1
# Conv3d(C->FEAT) stand-in is used.  Being linear and pointwise it commutes with
# the global average pool, so the kernel pools first and applies it as C scaled
# row-broadcasts on the VPU (cheaper than a K=3 MXU matmul).
# TODO(synk): for real S3D sizes (S ~ 1e5-1e6) the encoder path needs a grid +
# BlockSpec tiling over S with a VMEM accumulator; at demo sizes whole-array
# VMEM blocks fit comfortably.
# ----------------------------------------------------------------------------
def _coclr_fused_kernel(xs_ref, wb_ref, bb_ref, w1_ref, b1_ref, w2_ref, b2_ref,
                        qpack_ref, vsrc_ref, vname_ref, logits_ref, mask_ref,
                        *, topk, queue_is_full, inv_t):
    n_views, c_in, b, _ = xs_ref.shape
    kp1 = vname_ref.shape[1]               # K + 1
    seg = qpack_ref.shape[1] - kp1         # aligned start of the queue_second segment

    # ---- the three encoder heads (statically unrolled over views) -----------
    outs = []
    for v in range(n_views):
        wb_v = wb_ref[v]                                            # (C, FEAT)
        feat = bb_ref[v]                                            # (1, FEAT)
        for c in range(c_in):
            pooled = jnp.mean(xs_ref[v, c], axis=-1, keepdims=True)   # (B, 1) global pool
            feat = feat + pooled * wb_v[c:c + 1, :]                   # (B, FEAT)
        h = jnp.dot(feat, w1_ref[v], preferred_element_type=jnp.float32) + b1_ref[v]
        h = jnp.maximum(h, 0.0)                                       # ReLU
        y = jnp.dot(h, w2_ref[v], preferred_element_type=jnp.float32) + b2_ref[v]
        ssq = jnp.sum(y * y, axis=1, keepdims=True)
        outs.append(y * jax.lax.rsqrt(jnp.maximum(ssq, 1e-24)))       # F.normalize(dim=1)
    q, k, kf = outs

    # ---- one fused MXU push: [q; kf] @ [0 | queue | pad | 0 | queue_second] --
    qkf = jnp.concatenate([q, kf], axis=0)                            # (2B, DIM)
    sims = jnp.dot(qkf, qpack_ref[...], preferred_element_type=jnp.float32)
    ext_l = sims[:b, :kp1]                # [0 | q.queue]          (B, K+1), aligned
    col = jax.lax.broadcasted_iota(jnp.int32, (b, kp1), 1)

    # logits: col 0 = l_pos, cols 1..K = l_neg -> single dense (B, K+1) store
    l_pos = jnp.sum(q * k, axis=1, keepdims=True)                     # (B, 1)
    logits_ref[...] = jnp.where(col == 0, l_pos, ext_l) * inv_t

    # positive mask: col 0 always True, cols 1..K = vsource match (+ top-k mining)
    mask = jnp.logical_or(col == 0, vsrc_ref[...] == vname_ref[...])  # (B, K+1) bool

    if queue_is_full and topk != 0:       # static Python control flow
        ext_s = sims[b:, seg:seg + kp1]   # [0 | kf.queue_second]  (B, K+1), aligned
        # torch.topk + scatter-ones as iterative argmax: one lane-reduce per pick.
        # Edge cases: exact float ties, or rows with < topk unmasked columns, can
        # mark a different / smaller set than torch.topk (not hit with continuous
        # data and >= topk unmasked entries per row).
        sim = jnp.where(mask, _NEG_SENTINEL, ext_s)   # mask sources and dummy col 0
        for _ in range(topk):
            rowmax = jnp.max(sim, axis=1, keepdims=True)
            sel = jnp.logical_and(sim == rowmax, rowmax > _NEG_SENTINEL)
            mask = jnp.logical_or(mask, sel)
            sim = jnp.where(sel, _NEG_SENTINEL, sim)

    mask_ref[...] = mask.astype(jnp.int8)


# ----------------------------------------------------------------------------
# Wrapper: layout plumbing + single pallas_call
# ----------------------------------------------------------------------------
def coclr_forward(block1, block2, k_vsource, params, buffers, queue_is_full,
                  reverse=False):
    B = block1.shape[0]
    assert block1.shape[1] == 2

    def flat(v):  # (B, C, T, H, W) -> (C, B, T*H*W): spatial axis lane-dense
        return jnp.transpose(v, (1, 0, 2, 3, 4)).reshape(v.shape[1], v.shape[0], -1)

    x1, f1 = flat(block1[:, 0]), flat(block1[:, 1])
    x2, f2 = flat(block2[:, 0]), flat(block2[:, 1])
    if reverse:
        x1, f1 = f1, x1
        x2, f2 = f2, x2
    xs = jnp.stack([x1, x2, f2], axis=0)                 # (3, C, B, S): q, k, sampler views

    # TODO(synk): momentum update of encoder_k, DDP batch shuffle/unshuffle
    # (identity on one device) and _dequeue_and_enqueue are training-time side
    # effects; eval-mode forward only.
    heads = (params["q"], params["k"], params["s"])
    stacked = [jnp.stack([h[i] for h in heads], axis=0) for i in range(6)]

    queue, queue_second, queue_vname = buffers
    dim, k_sz = queue.shape
    kp1 = k_sz + 1
    seg = -(-kp1 // 128) * 128            # 128-aligned start of queue_second segment
    # Packed queue buffer [0 | queue | pad-zeros | 0 | queue_second]; in a real
    # training loop this layout would be maintained directly as the registered buffer.
    qpack = jnp.concatenate(
        [jnp.zeros((dim, 1), jnp.float32), queue.astype(jnp.float32),
         jnp.zeros((dim, seg - k_sz), jnp.float32), queue_second.astype(jnp.float32)],
        axis=1)                                                       # (DIM, seg + K + 1)
    vsrc = k_vsource.astype(jnp.int32).reshape(B, 1)
    vname_ext = jnp.concatenate(
        [jnp.full((1, 1), -1, jnp.int32),
         queue_vname.astype(jnp.int32).reshape(1, k_sz)], axis=1)     # (1, K+1)

    kern = functools.partial(
        _coclr_fused_kernel, topk=TOPK, queue_is_full=bool(queue_is_full),
        inv_t=1.0 / T_SOFTMAX)

    logits, mask_i8 = pl.pallas_call(
        kern,
        out_shape=(jax.ShapeDtypeStruct((B, kp1), jnp.float32),
                   jax.ShapeDtypeStruct((B, kp1), jnp.int8)),
        in_specs=[_vmem_spec()] * 10,
        out_specs=(_vmem_spec(), _vmem_spec()),
    )(xs, *stacked, qpack, vsrc, vname_ext)

    return logits, mask_i8.astype(jnp.bool_)


# ----------------------------------------------------------------------------
# Pure-JAX reference (for correctness check only)
# ----------------------------------------------------------------------------
def _ref_encode(x_bcs, head_params):
    hp = jax.lax.Precision.HIGHEST
    wb, bb, w1, b1, w2, b2 = head_params
    pooled = jnp.mean(x_bcs, axis=2)                      # (B, C)
    feat = jnp.dot(pooled, wb, precision=hp) + bb
    h = jnp.maximum(jnp.dot(feat, w1, precision=hp) + b1, 0.0)
    y = jnp.dot(h, w2, precision=hp) + b2
    n = jnp.sqrt(jnp.sum(y * y, axis=1, keepdims=True))
    return y / jnp.maximum(n, 1e-12)


def reference_forward(block1, block2, k_vsource, params, buffers, queue_is_full):
    hp = jax.lax.Precision.HIGHEST
    flat = lambda v: v.reshape(v.shape[0], v.shape[1], -1)
    x1 = flat(block1[:, 0])
    x2 = flat(block2[:, 0])
    f2 = flat(block2[:, 1])
    q = _ref_encode(x1, params["q"])
    k = _ref_encode(x2, params["k"])
    kf = _ref_encode(f2, params["s"])
    queue, queue_second, queue_vname = buffers
    l_pos = jnp.sum(q * k, axis=1, keepdims=True)
    l_neg = jnp.dot(q, queue, precision=hp)
    logits = jnp.concatenate([l_pos, l_neg], axis=1) / T_SOFTMAX
    mask_source = k_vsource[:, None] == queue_vname[None, :]
    mask = mask_source
    if queue_is_full and TOPK != 0:
        mask_sim = jnp.dot(kf, queue_second, precision=hp)
        mask_sim = jnp.where(mask_source, -jnp.inf, mask_sim)
        _, topkidx = jax.lax.top_k(mask_sim, TOPK)
        onehot = jnp.zeros_like(mask_sim).at[
            jnp.arange(mask_sim.shape[0])[:, None], topkidx].set(1.0)
        mask = jnp.logical_or(mask, onehot.astype(bool))
    mask = jnp.concatenate([jnp.ones((mask.shape[0], 1), dtype=bool), mask], axis=1)
    return logits, mask


def init_head_params(key):
    ks = jax.random.split(key, 6)
    wb = jax.random.normal(ks[0], (C_IN, FEAT), jnp.float32) * 0.1
    bb = jax.random.normal(ks[1], (1, FEAT), jnp.float32) * 0.1
    w1 = jax.random.normal(ks[2], (FEAT, FEAT), jnp.float32) * (1.0 / np.sqrt(FEAT))
    b1 = jax.random.normal(ks[3], (1, FEAT), jnp.float32) * 0.01
    w2 = jax.random.normal(ks[4], (FEAT, DIM), jnp.float32) * (1.0 / np.sqrt(FEAT))
    b2 = jax.random.normal(ks[5], (1, DIM), jnp.float32) * 0.01
    return (wb, bb, w1, b1, w2, b2)


if __name__ == "__main__":
    B, T, H, W = 8, 4, 8, 8
    key = jax.random.PRNGKey(0)
    k1, k2, kq, kq2, kp1_, kp2_ = jax.random.split(key, 6)

    block1 = jax.random.normal(k1, (B, 2, C_IN, T, H, W), jnp.float32)
    block2 = jax.random.normal(k2, (B, 2, C_IN, T, H, W), jnp.float32)
    k_vsource = jnp.array([3, 7, 36, 50, 0, 12, 5, 21], dtype=jnp.int32)

    enc_q_params = init_head_params(kp1_)
    sampler_params = init_head_params(kp2_)
    # encoder_k copies encoder_q's params at init (param_k.data.copy_(param_q.data))
    params = {"q": enc_q_params, "k": enc_q_params, "s": sampler_params}

    queue = jax.random.normal(kq, (DIM, K), jnp.float32)
    queue = queue / jnp.linalg.norm(queue, axis=0, keepdims=True)
    queue_second = jax.random.normal(kq2, (DIM, K), jnp.float32)
    queue_second = queue_second / jnp.linalg.norm(queue_second, axis=0, keepdims=True)
    queue_vname = jnp.asarray(np.arange(K) % 37, dtype=jnp.int32)
    queue_label = np.ones((K,), dtype=np.int64)        # simulate a warm (full) queue
    queue_is_full = bool(np.all(queue_label != -1))    # static, like torch's Python `if`

    buffers = (queue, queue_second, queue_vname)

    logits, mask = coclr_forward(block1, block2, k_vsource, params, buffers,
                                 queue_is_full)
    jax.block_until_ready((logits, mask))

    ref_logits, ref_mask = reference_forward(block1, block2, k_vsource, params,
                                             buffers, queue_is_full)
    np.testing.assert_allclose(np.asarray(logits), np.asarray(ref_logits),
                               rtol=2e-3, atol=2e-3)
    assert np.array_equal(np.asarray(mask), np.asarray(ref_mask))
    assert logits.shape == (B, K + 1) and mask.shape == (B, K + 1)
    print("KERNEL_OK")
</pallas_src>

<mosaic_0001>
module attributes {stable_mosaic.version = 11 : i64} {
  func.func @_coclr_fused_kernel(%arg0: memref<3x3x8x256xf32, #tpu.memory_space<vmem>>, %arg1: memref<3x3x128xf32, #tpu.memory_space<vmem>>, %arg2: memref<3x1x128xf32, #tpu.memory_space<vmem>>, %arg3: memref<3x128x128xf32, #tpu.memory_space<vmem>>, %arg4: memref<3x1x128xf32, #tpu.memory_space<vmem>>, %arg5: memref<3x128x128xf32, #tpu.memory_space<vmem>>, %arg6: memref<3x1x128xf32, #tpu.memory_space<vmem>>, %arg7: memref<128x641xf32, #tpu.memory_space<vmem>>, %arg8: memref<8x1xi32, #tpu.memory_space<vmem>>, %arg9: memref<1x257xi32, #tpu.memory_space<vmem>>, %arg10: memref<8x257xf32, #tpu.memory_space<vmem>>, %arg11: memref<8x257xi8, #tpu.memory_space<vmem>>) attributes {dimension_semantics = [], scalar_prefetch = 0 : i64, scratch_operands = 0 : i64, tpu.core_type = #tpu.core_type<tc>} {
    %c0 = arith.constant 0 : index
    %c0_0 = arith.constant 0 : index
    %c0_1 = arith.constant 0 : index
    %0 = vector.load %arg1[%c0, %c0_0, %c0_1] : memref<3x3x128xf32, #tpu.memory_space<vmem>>, vector<1x3x128xf32>
    %1 = vector.shape_cast %0 : vector<1x3x128xf32> to vector<3x128xf32>
    %c0_2 = arith.constant 0 : index
    %c0_3 = arith.constant 0 : index
    %c0_4 = arith.constant 0 : index
    %2 = vector.load %arg2[%c0_2, %c0_3, %c0_4] : memref<3x1x128xf32, #tpu.memory_space<vmem>>, vector<1x1x128xf32>
    %3 = vector.shape_cast %2 : vector<1x1x128xf32> to vector<1x128xf32>
    %c0_5 = arith.constant 0 : index
    %c0_6 = arith.constant 0 : index
    %c0_7 = arith.constant 0 : index
    %c0_8 = arith.constant 0 : index
    %4 = vector.load %arg0[%c0_5, %c0_6, %c0_7, %c0_8] : memref<3x3x8x256xf32, #tpu.memory_space<vmem>>, vector<1x1x8x256xf32>
    %5 = vector.shape_cast %4 : vector<1x1x8x256xf32> to vector<8x256xf32>
    %cst = arith.constant dense<0.000000e+00> : vector<8xf32>
    %6 = vector.multi_reduction <add>, %5, %cst [1] : vector<8x256xf32> to vector<8xf32>
    %7 = vector.shape_cast %6 : vector<8xf32> to vector<8x1xf32>
    %cst_9 = arith.constant 2.560000e+02 : f32
    %8 = vector.broadcast %cst_9 : f32 to vector<8x1xf32>
    %9 = arith.divf %7, %8 : vector<8x1xf32>
    %10 = vector.extract_strided_slice %1 {offsets = [0, 0], sizes = [1, 128], strides = [1, 1]} : vector<3x128xf32> to vector<1x128xf32>
    %11 = vector.broadcast %9 : vector<8x1xf32> to vector<8x128xf32>
    %12 = vector.broadcast %10 : vector<1x128xf32> to vector<8x128xf32>
    %13 = arith.mulf %11, %12 : vector<8x128xf32>
    %14 = vector.broadcast %3 : vector<1x128xf32> to vector<8x128xf32>
    %15 = arith.addf %14, %13 : vector<8x128xf32>
    %c0_10 = arith.constant 0 : index
    %c1 = arith.constant 1 : index
    %c0_11 = arith.constant 0 : index
    %c0_12 = arith.constant 0 : index
    %16 = vector.load %arg0[%c0_10, %c1, %c0_11, %c0_12] : memref<3x3x8x256xf32, #tpu.memory_space<vmem>>, vector<1x1x8x256xf32>
    %17 = vector.shape_cast %16 : vector<1x1x8x256xf32> to vector<8x256xf32>
    %cst_13 = arith.constant dense<0.000000e+00> : vector<8xf32>
    %18 = vector.multi_reduction <add>, %17, %cst_13 [1] : vector<8x256xf32> to vector<8xf32>
    %19 = vector.shape_cast %18 : vector<8xf32> to vector<8x1xf32>
    %cst_14 = arith.constant 2.560000e+02 : f32
    %20 = vector.broadcast %cst_14 : f32 to vector<8x1xf32>
    %21 = arith.divf %19, %20 : vector<8x1xf32>
    %22 = vector.extract_strided_slice %1 {offsets = [1, 0], sizes = [1, 128], strides = [1, 1]} : vector<3x128xf32> to vector<1x128xf32>
    %23 = vector.broadcast %21 : vector<8x1xf32> to vector<8x128xf32>
    %24 = vector.broadcast %22 : vector<1x128xf32> to vector<8x128xf32>
    %25 = arith.mulf %23, %24 : vector<8x128xf32>
    %26 = arith.addf %15, %25 : vector<8x128xf32>
    %c0_15 = arith.constant 0 : index
    %c2 = arith.constant 2 : index
    %c0_16 = arith.constant 0 : index
    %c0_17 = arith.constant 0 : index
    %27 = vector.load %arg0[%c0_15, %c2, %c0_16, %c0_17] : memref<3x3x8x256xf32, #tpu.memory_space<vmem>>, vector<1x1x8x256xf32>
    %28 = vector.shape_cast %27 : vector<1x1x8x256xf32> to vector<8x256xf32>
    %cst_18 = arith.constant dense<0.000000e+00> : vector<8xf32>
    %29 = vector.multi_reduction <add>, %28, %cst_18 [1] : vector<8x256xf32> to vector<8xf32>
    %30 = vector.shape_cast %29 : vector<8xf32> to vector<8x1xf32>
    %cst_19 = arith.constant 2.560000e+02 : f32
    %31 = vector.broadcast %cst_19 : f32 to vector<8x1xf32>
    %32 = arith.divf %30, %31 : vector<8x1xf32>
    %33 = vector.extract_strided_slice %1 {offsets = [2, 0], sizes = [1, 128], strides = [1, 1]} : vector<3x128xf32> to vector<1x128xf32>
    %34 = vector.broadcast %32 : vector<8x1xf32> to vector<8x128xf32>
    %35 = vector.broadcast %33 : vector<1x128xf32> to vector<8x128xf32>
    %36 = arith.mulf %34, %35 : vector<8x128xf32>
    %37 = arith.addf %26, %36 : vector<8x128xf32>
    %c0_20 = arith.constant 0 : index
    %c0_21 = arith.constant 0 : index
    %c0_22 = arith.constant 0 : index
    %38 = vector.load %arg3[%c0_20, %c0_21, %c0_22] : memref<3x128x128xf32, #tpu.memory_space<vmem>>, vector<1x128x128xf32>
    %39 = vector.shape_cast %38 : vector<1x128x128xf32> to vector<128x128xf32>
    %cst_23 = arith.constant dense<0.000000e+00> : vector<8x128xf32>
    %40 = tpu.matmul %37, %39, %cst_23 {dimension_numbers = #tpu.dot_dimension_numbers<[1], [0], [0], [1], [0, 0, 1, 1], [], []>} : vector<8x128xf32>, vector<128x128xf32>, vector<8x128xf32> -> vector<8x128xf32>
    %c0_24 = arith.constant 0 : index
    %c0_25 = arith.constant 0 : index
    %c0_26 = arith.constant 0 : index
    %41 = vector.load %arg4[%c0_24, %c0_25, %c0_26] : memref<3x1x128xf32, #tpu.memory_space<vmem>>, vector<1x1x128xf32>
    %42 = vector.shape_cast %41 : vector<1x1x128xf32> to vector<1x128xf32>
    %43 = vector.broadcast %42 : vector<1x128xf32> to vector<8x128xf32>
    %44 = arith.addf %40, %43 : vector<8x128xf32>
    %cst_27 = arith.constant 0.000000e+00 : f32
    %45 = vector.broadcast %cst_27 : f32 to vector<8x128xf32>
    %46 = arith.maximumf %44, %45 : vector<8x128xf32>
    %c0_28 = arith.constant 0 : index
    %c0_29 = arith.constant 0 : index
    %c0_30 = arith.constant 0 : index
    %47 = vector.load %arg5[%c0_28, %c0_29, %c0_30] : memref<3x128x128xf32, #tpu.memory_space<vmem>>, vector<1x128x128xf32>
    %48 = vector.shape_cast %47 : vector<1x128x128xf32> to vector<128x128xf32>
    %cst_31 = arith.constant dense<0.000000e+00> : vector<8x128xf32>
    %49 = tpu.matmul %46, %48, %cst_31 {dimension_numbers = #tpu.dot_dimension_numbers<[1], [0], [0], [1], [0, 0, 1, 1], [], []>} : vector<8x128xf32>, vector<128x128xf32>, vector<8x128xf32> -> vector<8x128xf32>
    %c0_32 = arith.constant 0 : index
    %c0_33 = arith.constant 0 : index
    %c0_34 = arith.constant 0 : index
    %50 = vector.load %arg6[%c0_32, %c0_33, %c0_34] : memref<3x1x128xf32, #tpu.memory_space<vmem>>, vector<1x1x128xf32>
    %51 = vector.shape_cast %50 : vector<1x1x128xf32> to vector<1x128xf32>
    %52 = vector.broadcast %51 : vector<1x128xf32> to vector<8x128xf32>
    %53 = arith.addf %49, %52 : vector<8x128xf32>
    %54 = arith.mulf %53, %53 : vector<8x128xf32>
    %cst_35 = arith.constant dense<0.000000e+00> : vector<8xf32>
    %55 = vector.multi_reduction <add>, %54, %cst_35 [1] : vector<8x128xf32> to vector<8xf32>
    %56 = vector.shape_cast %55 : vector<8xf32> to vector<8x1xf32>
    %cst_36 = arith.constant 1.000000e-24 : f32
    %57 = vector.broadcast %cst_36 : f32 to vector<8x1xf32>
    %58 = arith.maximumf %56, %57 : vector<8x1xf32>
    %59 = math.rsqrt %58 : vector<8x1xf32>
    %60 = vector.broadcast %59 : vector<8x1xf32> to vector<8x128xf32>
    %61 = arith.mulf %53, %60 : vector<8x128xf32>
    %c1_37 = arith.constant 1 : index
    %c0_38 = arith.constant 0 : index
    %c0_39 = arith.constant 0 : index
    %62 = vector.load %arg1[%c1_37, %c0_38, %c0_39] : memref<3x3x128xf32, #tpu.memory_space<vmem>>, vector<1x3x128xf32>
    %63 = vector.shape_cast %62 : vector<1x3x128xf32> to vector<3x128xf32>
    %c1_40 = arith.constant 1 : index
    %c0_41 = arith.constant 0 : index
    %c0_42 = arith.constant 0 : index
    %64 = vector.load %arg2[%c1_40, %c0_41, %c0_42] : memref<3x1x128xf32, #tpu.memory_space<vmem>>, vector<1x1x128xf32>
    %65 = vector.shape_cast %64 : vector<1x1x128xf32> to vector<1x128xf32>
    %c1_43 = arith.constant 1 : index
    %c0_44 = arith.constant 0 : index
    %c0_45 = arith.constant 0 : index
    %c0_46 = arith.constant 0 : index
    %66 = vector.load %arg0[%c1_43, %c0_44, %c0_45, %c0_46] : memref<3x3x8x256xf32, #tpu.memory_space<vmem>>, vector<1x1x8x256xf32>
    %67 = vector.shape_cast %66 : vector<1x1x8x256xf32> to vector<8x256xf32>
    %cst_47 = arith.constant dense<0.000000e+00> : vector<8xf32>
    %68 = vector.multi_reduction <add>, %67, %cst_47 [1] : vector<8x256xf32> to vector<8xf32>
    %69 = vector.shape_cast %68 : vector<8xf32> to vector<8x1xf32>
    %cst_48 = arith.constant 2.560000e+02 : f32
    %70 = vector.broadcast %cst_48 : f32 to vector<8x1xf32>
    %71 = arith.divf %69, %70 : vector<8x1xf32>
    %72 = vector.extract_strided_slice %63 {offsets = [0, 0], sizes = [1, 128], strides = [1, 1]} : vector<3x128xf32> to vector<1x128xf32>
    %73 = vector.broadcast %71 : vector<8x1xf32> to vector<8x128xf32>
    %74 = vector.broadcast %72 : vector<1x128xf32> to vector<8x128xf32>
    %75 = arith.mulf %73, %74 : vector<8x128xf32>
    %76 = vector.broadcast %65 : vector<1x128xf32> to vector<8x128xf32>
    %77 = arith.addf %76, %75 : vector<8x128xf32>
    %c1_49 = arith.constant 1 : index
    %c1_50 = arith.constant 1 : index
    %c0_51 = arith.constant 0 : index
    %c0_52 = arith.constant 0 : index
    %78 = vector.load %arg0[%c1_49, %c1_50, %c0_51, %c0_52] : memref<3x3x8x256xf32, #tpu.memory_space<vmem>>, vector<1x1x8x256xf32>
    %79 = vector.shape_cast %78 : vector<1x1x8x256xf32> to vector<8x256xf32>
    %cst_53 = arith.constant dense<0.000000e+00> : vector<8xf32>
    %80 = vector.multi_reduction <add>, %79, %cst_53 [1] : vector<8x256xf32> to vector<8xf32>
    %81 = vector.shape_cast %80 : vector<8xf32> to vector<8x1xf32>
    %cst_54 = arith.constant 2.560000e+02 : f32
    %82 = vector.broadcast %cst_54 : f32 to vector<8x1xf32>
    %83 = arith.divf %81, %82 : vector<8x1xf32>
    %84 = vector.extract_strided_slice %63 {offsets = [1, 0], sizes = [1, 128], strides = [1, 1]} : vector<3x128xf32> to vector<1x128xf32>
    %85 = vector.broadcast %83 : vector<8x1xf32> to vector<8x128xf32>
    %86 = vector.broadcast %84 : vector<1x128xf32> to vector<8x128xf32>
    %87 = arith.mulf %85, %86 : vector<8x128xf32>
    %88 = arith.addf %77, %87 : vector<8x128xf32>
    %c1_55 = arith.constant 1 : index
    %c2_56 = arith.constant 2 : index
    %c0_57 = arith.constant 0 : index
    %c0_58 = arith.constant 0 : index
    %89 = vector.load %arg0[%c1_55, %c2_56, %c0_57, %c0_58] : memref<3x3x8x256xf32, #tpu.memory_space<vmem>>, vector<1x1x8x256xf32>
    %90 = vector.shape_cast %89 : vector<1x1x8x256xf32> to vector<8x256xf32>
    %cst_59 = arith.constant dense<0.000000e+00> : vector<8xf32>
    %91 = vector.multi_reduction <add>, %90, %cst_59 [1] : vector<8x256xf32> to vector<8xf32>
    %92 = vector.shape_cast %91 : vector<8xf32> to vector<8x1xf32>
    %cst_60 = arith.constant 2.560000e+02 : f32
    %93 = vector.broadcast %cst_60 : f32 to vector<8x1xf32>
    %94 = arith.divf %92, %93 : vector<8x1xf32>
    %95 = vector.extract_strided_slice %63 {offsets = [2, 0], sizes = [1, 128], strides = [1, 1]} : vector<3x128xf32> to vector<1x128xf32>
    %96 = vector.broadcast %94 : vector<8x1xf32> to vector<8x128xf32>
    %97 = vector.broadcast %95 : vector<1x128xf32> to vector<8x128xf32>
    %98 = arith.mulf %96, %97 : vector<8x128xf32>
    %99 = arith.addf %88, %98 : vector<8x128xf32>
    %c1_61 = arith.constant 1 : index
    %c0_62 = arith.constant 0 : index
    %c0_63 = arith.constant 0 : index
    %100 = vector.load %arg3[%c1_61, %c0_62, %c0_63] : memref<3x128x128xf32, #tpu.memory_space<vmem>>, vector<1x128x128xf32>
    %101 = vector.shape_cast %100 : vector<1x128x128xf32> to vector<128x128xf32>
    %cst_64 = arith.constant dense<0.000000e+00> : vector<8x128xf32>
    %102 = tpu.matmul %99, %101, %cst_64 {dimension_numbers = #tpu.dot_dimension_numbers<[1], [0], [0], [1], [0, 0, 1, 1], [], []>} : vector<8x128xf32>, vector<128x128xf32>, vector<8x128xf32> -> vector<8x128xf32>
    %c1_65 = arith.constant 1 : index
    %c0_66 = arith.constant 0 : index
    %c0_67 = arith.constant 0 : index
    %103 = vector.load %arg4[%c1_65, %c0_66, %c0_67] : memref<3x1x128xf32, #tpu.memory_space<vmem>>, vector<1x1x128xf32>
    %104 = vector.shape_cast %103 : vector<1x1x128xf32> to vector<1x128xf32>
    %105 = vector.broadcast %104 : vector<1x128xf32> to vector<8x128xf32>
    %106 = arith.addf %102, %105 : vector<8x128xf32>
    %cst_68 = arith.constant 0.000000e+00 : f32
    %107 = vector.broadcast %cst_68 : f32 to vector<8x128xf32>
    %108 = arith.maximumf %106, %107 : vector<8x128xf32>
    %c1_69 = arith.constant 1 : index
    %c0_70 = arith.constant 0 : index
    %c0_71 = arith.constant 0 : index
    %109 = vector.load %arg5[%c1_69, %c0_70, %c0_71] : memref<3x128x128xf32, #tpu.memory_space<vmem>>, vector<1x128x128xf32>
    %110 = vector.shape_cast %109 : vector<1x128x128xf32> to vector<128x128xf32>
    %cst_72 = arith.constant dense<0.000000e+00> : vector<8x128xf32>
    %111 = tpu.matmul %108, %110, %cst_72 {dimension_numbers = #tpu.dot_dimension_numbers<[1], [0], [0], [1], [0, 0, 1, 1], [], []>} : vector<8x128xf32>, vector<128x128xf32>, vector<8x128xf32> -> vector<8x128xf32>
    %c1_73 = arith.constant 1 : index
    %c0_74 = arith.constant 0 : index
    %c0_75 = arith.constant 0 : index
    %112 = vector.load %arg6[%c1_73, %c0_74, %c0_75] : memref<3x1x128xf32, #tpu.memory_space<vmem>>, vector<1x1x128xf32>
    %113 = vector.shape_cast %112 : vector<1x1x128xf32> to vector<1x128xf32>
    %114 = vector.broadcast %113 : vector<1x128xf32> to vector<8x128xf32>
    %115 = arith.addf %111, %114 : vector<8x128xf32>
    %116 = arith.mulf %115, %115 : vector<8x128xf32>
    %cst_76 = arith.constant dense<0.000000e+00> : vector<8xf32>
    %117 = vector.multi_reduction <add>, %116, %cst_76 [1] : vector<8x128xf32> to vector<8xf32>
    %118 = vector.shape_cast %117 : vector<8xf32> to vector<8x1xf32>
    %cst_77 = arith.constant 1.000000e-24 : f32
    %119 = vector.broadcast %cst_77 : f32 to vector<8x1xf32>
    %120 = arith.maximumf %118, %119 : vector<8x1xf32>
    %121 = math.rsqrt %120 : vector<8x1xf32>
    %122 = vector.broadcast %121 : vector<8x1xf32> to vector<8x128xf32>
    %123 = arith.mulf %115, %122 : vector<8x128xf32>
    %c2_78 = arith.constant 2 : index
    %c0_79 = arith.constant 0 : index
    %c0_80 = arith.constant 0 : index
    %124 = vector.load %arg1[%c2_78, %c0_79, %c0_80] : memref<3x3x128xf32, #tpu.memory_space<vmem>>, vector<1x3x128xf32>
    %125 = vector.shape_cast %124 : vector<1x3x128xf32> to vector<3x128xf32>
    %c2_81 = arith.constant 2 : index
    %c0_82 = arith.constant 0 : index
    %c0_83 = arith.constant 0 : index
    %126 = vector.load %arg2[%c2_81, %c0_82, %c0_83] : memref<3x1x128xf32, #tpu.memory_space<vmem>>, vector<1x1x128xf32>
    %127 = vector.shape_cast %126 : vector<1x1x128xf32> to vector<1x128xf32>
    %c2_84 = arith.constant 2 : index
    %c0_85 = arith.constant 0 : index
    %c0_86 = arith.constant 0 : index
    %c0_87 = arith.constant 0 : index
    %128 = vector.load %arg0[%c2_84, %c0_85, %c0_86, %c0_87] : memref<3x3x8x256xf32, #tpu.memory_space<vmem>>, vector<1x1x8x256xf32>
    %129 = vector.shape_cast %128 : vector<1x1x8x256xf32> to vector<8x256xf32>
    %cst_88 = arith.constant dense<0.000000e+00> : vector<8xf32>
    %130 = vector.multi_reduction <add>, %129, %cst_88 [1] : vector<8x256xf32> to vector<8xf32>
    %131 = vector.shape_cast %130 : vector<8xf32> to vector<8x1xf32>
    %cst_89 = arith.constant 2.560000e+02 : f32
    %132 = vector.broadcast %cst_89 : f32 to vector<8x1xf32>
    %133 = arith.divf %131, %132 : vector<8x1xf32>
    %134 = vector.extract_strided_slice %125 {offsets = [0, 0], sizes = [1, 128], strides = [1, 1]} : vector<3x128xf32> to vector<1x128xf32>
    %135 = vector.broadcast %133 : vector<8x1xf32> to vector<8x128xf32>
    %136 = vector.broadcast %134 : vector<1x128xf32> to vector<8x128xf32>
    %137 = arith.mulf %135, %136 : vector<8x128xf32>
    %138 = vector.broadcast %127 : vector<1x128xf32> to vector<8x128xf32>
    %139 = arith.addf %138, %137 : vector<8x128xf32>
    %c2_90 = arith.constant 2 : index
    %c1_91 = arith.constant 1 : index
    %c0_92 = arith.constant 0 : index
    %c0_93 = arith.constant 0 : index
    %140 = vector.load %arg0[%c2_90, %c1_91, %c0_92, %c0_93] : memref<3x3x8x256xf32, #tpu.memory_space<vmem>>, vector<1x1x8x256xf32>
    %141 = vector.shape_cast %140 : vector<1x1x8x256xf32> to vector<8x256xf32>
    %cst_94 = arith.constant dense<0.000000e+00> : vector<8xf32>
    %142 = vector.multi_reduction <add>, %141, %cst_94 [1] : vector<8x256xf32> to vector<8xf32>
    %143 = vector.shape_cast %142 : vector<8xf32> to vector<8x1xf32>
    %cst_95 = arith.constant 2.560000e+02 : f32
    %144 = vector.broadcast %cst_95 : f32 to vector<8x1xf32>
    %145 = arith.divf %143, %144 : vector<8x1xf32>
    %146 = vector.extract_strided_slice %125 {offsets = [1, 0], sizes = [1, 128], strides = [1, 1]} : vector<3x128xf32> to vector<1x128xf32>
    %147 = vector.broadcast %145 : vector<8x1xf32> to vector<8x128xf32>
    %148 = vector.broadcast %146 : vector<1x128xf32> to vector<8x128xf32>
    %149 = arith.mulf %147, %148 : vector<8x128xf32>
    %150 = arith.addf %139, %149 : vector<8x128xf32>
    %c2_96 = arith.constant 2 : index
    %c2_97 = arith.constant 2 : index
    %c0_98 = arith.constant 0 : index
    %c0_99 = arith.constant 0 : index
    %151 = vector.load %arg0[%c2_96, %c2_97, %c0_98, %c0_99] : memref<3x3x8x256xf32, #tpu.memory_space<vmem>>, vector<1x1x8x256xf32>
    %152 = vector.shape_cast %151 : vector<1x1x8x256xf32> to vector<8x256xf32>
    %cst_100 = arith.constant dense<0.000000e+00> : vector<8xf32>
    %153 = vector.multi_reduction <add>, %152, %cst_100 [1] : vector<8x256xf32> to vector<8xf32>
    %154 = vector.shape_cast %153 : vector<8xf32> to vector<8x1xf32>
    %cst_101 = arith.constant 2.560000e+02 : f32
    %155 = vector.broadcast %cst_101 : f32 to vector<8x1xf32>
    %156 = arith.divf %154, %155 : vector<8x1xf32>
    %157 = vector.extract_strided_slice %125 {offsets = [2, 0], sizes = [1, 128], strides = [1, 1]} : vector<3x128xf32> to vector<1x128xf32>
    %158 = vector.broadcast %156 : vector<8x1xf32> to vector<8x128xf32>
    %159 = vector.broadcast %157 : vector<1x128xf32> to vector<8x128xf32>
    %160 = arith.mulf %158, %159 : vector<8x128xf32>
    %161 = arith.addf %150, %160 : vector<8x128xf32>
    %c2_102 = arith.constant 2 : index
    %c0_103 = arith.constant 0 : index
    %c0_104 = arith.constant 0 : index
    %162 = vector.load %arg3[%c2_102, %c0_103, %c0_104] : memref<3x128x128xf32, #tpu.memory_space<vmem>>, vector<1x128x128xf32>
    %163 = vector.shape_cast %162 : vector<1x128x128xf32> to vector<128x128xf32>
    %cst_105 = arith.constant dense<0.000000e+00> : vector<8x128xf32>
    %164 = tpu.matmul %161, %163, %cst_105 {dimension_numbers = #tpu.dot_dimension_numbers<[1], [0], [0], [1], [0, 0, 1, 1], [], []>} : vector<8x128xf32>, vector<128x128xf32>, vector<8x128xf32> -> vector<8x128xf32>
    %c2_106 = arith.constant 2 : index
    %c0_107 = arith.constant 0 : index
    %c0_108 = arith.constant 0 : index
    %165 = vector.load %arg4[%c2_106, %c0_107, %c0_108] : memref<3x1x128xf32, #tpu.memory_space<vmem>>, vector<1x1x128xf32>
    %166 = vector.shape_cast %165 : vector<1x1x128xf32> to vector<1x128xf32>
    %167 = vector.broadcast %166 : vector<1x128xf32> to vector<8x128xf32>
    %168 = arith.addf %164, %167 : vector<8x128xf32>
    %cst_109 = arith.constant 0.000000e+00 : f32
    %169 = vector.broadcast %cst_109 : f32 to vector<8x128xf32>
    %170 = arith.maximumf %168, %169 : vector<8x128xf32>
    %c2_110 = arith.constant 2 : index
    %c0_111 = arith.constant 0 : index
    %c0_112 = arith.constant 0 : index
    %171 = vector.load %arg5[%c2_110, %c0_111, %c0_112] : memref<3x128x128xf32, #tpu.memory_space<vmem>>, vector<1x128x128xf32>
    %172 = vector.shape_cast %171 : vector<1x128x128xf32> to vector<128x128xf32>
    %cst_113 = arith.constant dense<0.000000e+00> : vector<8x128xf32>
    %173 = tpu.matmul %170, %172, %cst_113 {dimension_numbers = #tpu.dot_dimension_numbers<[1], [0], [0], [1], [0, 0, 1, 1], [], []>} : vector<8x128xf32>, vector<128x128xf32>, vector<8x128xf32> -> vector<8x128xf32>
    %c2_114 = arith.constant 2 : index
    %c0_115 = arith.constant 0 : index
    %c0_116 = arith.constant 0 : index
    %174 = vector.load %arg6[%c2_114, %c0_115, %c0_116] : memref<3x1x128xf32, #tpu.memory_space<vmem>>, vector<1x1x128xf32>
    %175 = vector.shape_cast %174 : vector<1x1x128xf32> to vector<1x128xf32>
    %176 = vector.broadcast %175 : vector<1x128xf32> to vector<8x128xf32>
    %177 = arith.addf %173, %176 : vector<8x128xf32>
    %178 = arith.mulf %177, %177 : vector<8x128xf32>
    %cst_117 = arith.constant dense<0.000000e+00> : vector<8xf32>
    %179 = vector.multi_reduction <add>, %178, %cst_117 [1] : vector<8x128xf32> to vector<8xf32>
    %180 = vector.shape_cast %179 : vector<8xf32> to vector<8x1xf32>
    %cst_118 = arith.constant 1.000000e-24 : f32
    %181 = vector.broadcast %cst_118 : f32 to vector<8x1xf32>
    %182 = arith.maximumf %180, %181 : vector<8x1xf32>
    %183 = math.rsqrt %182 : vector<8x1xf32>
    %184 = vector.broadcast %183 : vector<8x1xf32> to vector<8x128xf32>
    %185 = arith.mulf %177, %184 : vector<8x128xf32>
    %186 = tpu.concatenate %61, %185 in 0 : vector<8x128xf32>, vector<8x128xf32> -> vector<16x128xf32>
    %c0_119 = arith.constant 0 : index
    %c0_120 = arith.constant 0 : index
    %187 = vector.load %arg7[%c0_119, %c0_120] : memref<128x641xf32, #tpu.memory_space<vmem>>, vector<128x641xf32>
    %cst_121 = arith.constant dense<0.000000e+00> : vector<16x641xf32>
    %188 = tpu.matmul %186, %187, %cst_121 {dimension_numbers = #tpu.dot_dimension_numbers<[1], [0], [0], [1], [0, 0, 1, 1], [], []>} : vector<16x128xf32>, vector<128x641xf32>, vector<16x641xf32> -> vector<16x641xf32>
    %189 = vector.extract_strided_slice %188 {offsets = [0, 0], sizes = [8, 257], strides = [1, 1]} : vector<16x641xf32> to vector<8x257xf32>
    %190 = tpu.iota {dimensions = array<i32: 1>} : vector<8x257xi32>
    %191 = arith.mulf %61, %123 : vector<8x128xf32>
    %cst_122 = arith.constant dense<0.000000e+00> : vector<8xf32>
    %192 = vector.multi_reduction <add>, %191, %cst_122 [1] : vector<8x128xf32> to vector<8xf32>
    %193 = vector.shape_cast %192 : vector<8xf32> to vector<8x1xf32>
    %c0_i32 = arith.constant 0 : i32
    %194 = vector.broadcast %c0_i32 : i32 to vector<8x257xi32>
    %195 = arith.cmpi eq, %190, %194 : vector<8x257xi32>
    %196 = vector.shape_cast %193 : vector<8x1xf32> to vector<8x1xf32>
    %197 = vector.broadcast %196 : vector<8x1xf32> to vector<8x257xf32>
    %198 = arith.select %195, %197, %189 : vector<8x257xi1>, vector<8x257xf32>
    %cst_123 = arith.constant 14.2857141 : f32
    %199 = vector.broadcast %cst_123 : f32 to vector<8x257xf32>
    %200 = arith.mulf %198, %199 : vector<8x257xf32>
    %c0_124 = arith.constant 0 : index
    %c0_125 = arith.constant 0 : index
    %201 = vector.load %arg10[%c0_124, %c0_125] : memref<8x257xf32, #tpu.memory_space<vmem>>, vector<8x257xf32>
    tpu.vector_store %arg10[%c0_124, %c0_125], %200 {strides = array<i32>} : memref<8x257xf32, #tpu.memory_space<vmem>>, vector<8x257xf32>,
    %c0_i32_126 = arith.constant 0 : i32
    %202 = vector.broadcast %c0_i32_126 : i32 to vector<8x257xi32>
    %203 = arith.cmpi eq, %190, %202 : vector<8x257xi32>
    %c0_127 = arith.constant 0 : index
    %c0_128 = arith.constant 0 : index
    %204 = vector.load %arg8[%c0_127, %c0_128] : memref<8x1xi32, #tpu.memory_space<vmem>>, vector<8x1xi32>
    %c0_129 = arith.constant 0 : index
    %c0_130 = arith.constant 0 : index
    %205 = vector.load %arg9[%c0_129, %c0_130] : memref<1x257xi32, #tpu.memory_space<vmem>>, vector<1x257xi32>
    %206 = vector.broadcast %204 : vector<8x1xi32> to vector<8x257xi32>
    %207 = vector.broadcast %205 : vector<1x257xi32> to vector<8x257xi32>
    %208 = arith.cmpi eq, %206, %207 : vector<8x257xi32>
    %209 = arith.ori %203, %208 : vector<8x257xi1>
    %210 = vector.extract_strided_slice %188 {offsets = [8, 384], sizes = [8, 257], strides = [1, 1]} : vector<16x641xf32> to vector<8x257xf32>
    %cst_131 = arith.constant -3.000000e+00 : f32
    %211 = vector.broadcast %cst_131 : f32 to vector<8x257xf32>
    %212 = arith.select %209, %211, %210 : vector<8x257xi1>, vector<8x257xf32>
    %cst_132 = arith.constant dense<0xFF800000> : vector<8xf32>
    %213 = vector.multi_reduction <maximumf>, %212, %cst_132 [1] : vector<8x257xf32> to vector<8xf32>
    %214 = vector.shape_cast %213 : vector<8xf32> to vector<8x1xf32>
    %215 = vector.broadcast %214 : vector<8x1xf32> to vector<8x257xf32>
    %216 = arith.cmpf oeq, %212, %215 : vector<8x257xf32>
    %cst_133 = arith.constant -3.000000e+00 : f32
    %217 = vector.broadcast %cst_133 : f32 to vector<8x1xf32>
    %218 = arith.cmpf ogt, %214, %217 : vector<8x1xf32>
    %219 = vector.broadcast %218 : vector<8x1xi1> to vector<8x257xi1>
    %220 = arith.andi %216, %219 : vector<8x257xi1>
    %221 = arith.ori %209, %220 : vector<8x257xi1>
    %cst_134 = arith.constant -3.000000e+00 : f32
    %222 = vector.broadcast %cst_134 : f32 to vector<8x257xf32>
    %223 = arith.select %220, %222, %212 : vector<8x257xi1>, vector<8x257xf32>
    %cst_135 = arith.constant dense<0xFF800000> : vector<8xf32>
    %224 = vector.multi_reduction <maximumf>, %223, %cst_135 [1] : vector<8x257xf32> to vector<8xf32>
    %225 = vector.shape_cast %224 : vector<8xf32> to vector<8x1xf32>
    %226 = vector.broadcast %225 : vector<8x1xf32> to vector<8x257xf32>
    %227 = arith.cmpf oeq, %223, %226 : vector<8x257xf32>
    %cst_136 = arith.constant -3.000000e+00 : f32
    %228 = vector.broadcast %cst_136 : f32 to vector<8x1xf32>
    %229 = arith.cmpf ogt, %225, %228 : vector<8x1xf32>
    %230 = vector.broadcast %229 : vector<8x1xi1> to vector<8x257xi1>
    %231 = arith.andi %227, %230 : vector<8x257xi1>
    %232 = arith.ori %221, %231 : vector<8x257xi1>
    %cst_137 = arith.constant -3.000000e+00 : f32
    %233 = vector.broadcast %cst_137 : f32 to vector<8x257xf32>
    %234 = arith.select %231, %233, %223 : vector<8x257xi1>, vector<8x257xf32>
    %cst_138 = arith.constant dense<0xFF800000> : vector<8xf32>
    %235 = vector.multi_reduction <maximumf>, %234, %cst_138 [1] : vector<8x257xf32> to vector<8xf32>
    %236 = vector.shape_cast %235 : vector<8xf32> to vector<8x1xf32>
    %237 = vector.broadcast %236 : vector<8x1xf32> to vector<8x257xf32>
    %238 = arith.cmpf oeq, %234, %237 : vector<8x257xf32>
    %cst_139 = arith.constant -3.000000e+00 : f32
    %239 = vector.broadcast %cst_139 : f32 to vector<8x1xf32>
    %240 = arith.cmpf ogt, %236, %239 : vector<8x1xf32>
    %241 = vector.broadcast %240 : vector<8x1xi1> to vector<8x257xi1>
    %242 = arith.andi %238, %241 : vector<8x257xi1>
    %243 = arith.ori %232, %242 : vector<8x257xi1>
    %cst_140 = arith.constant -3.000000e+00 : f32
    %244 = vector.broadcast %cst_140 : f32 to vector<8x257xf32>
    %245 = arith.select %242, %244, %234 : vector<8x257xi1>, vector<8x257xf32>
    %cst_141 = arith.constant dense<0xFF800000> : vector<8xf32>
    %246 = vector.multi_reduction <maximumf>, %245, %cst_141 [1] : vector<8x257xf32> to vector<8xf32>
    %247 = vector.shape_cast %246 : vector<8xf32> to vector<8x1xf32>
    %248 = vector.broadcast %247 : vector<8x1xf32> to vector<8x257xf32>
    %249 = arith.cmpf oeq, %245, %248 : vector<8x257xf32>
    %cst_142 = arith.constant -3.000000e+00 : f32
    %250 = vector.broadcast %cst_142 : f32 to vector<8x1xf32>
    %251 = arith.cmpf ogt, %247, %250 : vector<8x1xf32>
    %252 = vector.broadcast %251 : vector<8x1xi1> to vector<8x257xi1>
    %253 = arith.andi %249, %252 : vector<8x257xi1>
    %254 = arith.ori %243, %253 : vector<8x257xi1>
    %cst_143 = arith.constant -3.000000e+00 : f32
    %255 = vector.broadcast %cst_143 : f32 to vector<8x257xf32>
    %256 = arith.select %253, %255, %245 : vector<8x257xi1>, vector<8x257xf32>
    %cst_144 = arith.constant dense<0xFF800000> : vector<8xf32>
    %257 = vector.multi_reduction <maximumf>, %256, %cst_144 [1] : vector<8x257xf32> to vector<8xf32>
    %258 = vector.shape_cast %257 : vector<8xf32> to vector<8x1xf32>
    %259 = vector.broadcast %258 : vector<8x1xf32> to vector<8x257xf32>
    %260 = arith.cmpf oeq, %256, %259 : vector<8x257xf32>
    %cst_145 = arith.constant -3.000000e+00 : f32
    %261 = vector.broadcast %cst_145 : f32 to vector<8x1xf32>
    %262 = arith.cmpf ogt, %258, %261 : vector<8x1xf32>
    %263 = vector.broadcast %262 : vector<8x1xi1> to vector<8x257xi1>
    %264 = arith.andi %260, %263 : vector<8x257xi1>
    %265 = arith.ori %254, %264 : vector<8x257xi1>
    %266 = arith.extui %265 : vector<8x257xi1> to vector<8x257xi8>
    %c0_146 = arith.constant 0 : index
    %c0_147 = arith.constant 0 : index
    %267 = vector.load %arg11[%c0_146, %c0_147] : memref<8x257xi8, #tpu.memory_space<vmem>>, vector<8x257xi8>
    tpu.vector_store %arg11[%c0_146, %c0_147], %266 {strides = array<i32>} : memref<8x257xi8, #tpu.memory_space<vmem>>, vector<8x257xi8>,
    return
  }
}

</mosaic_0001>

<bundles_post_ra>
// kernel: tpu_custom_call.1
= control target key start
LH: loop header
LB: loop body
LE: loop exit
PB: predicated region body
PF: predicated region fallthrough
CT: control target
= control target key end

     0   :  { %17 = vsyncpa [#allocation3], 0  ;;  %v2013_v7 = vmov 0.0|0.0   ;;  %s3070_s0 = inlined_call_operand.vmem [shape: f32[3,3,8,256], index: 0, kind: input, shape index: {}]   ;;  %s3071_s1 = inlined_call_operand.vmem [shape: f32[3,3,128], index: 1, kind: input, shape index: {}]   ;;  %s3072_s2 = inlined_call_operand.vmem [shape: f32[3,1,128], index: 2, kind: input, shape index: {}]   ;;  %s3073_s3 = inlined_call_operand.vmem [shape: f32[3,128,128], index: 3, kind: input, shape index: {}]   ;;  %s3074_s4 = inlined_call_operand.vmem [shape: f32[3,1,128], index: 4, kind: input, shape index: {}]   ;;  %s3075_s5 = inlined_call_operand.vmem [shape: f32[3,128,128], index: 5, kind: input, shape index: {}]   ;;  %s3076_s6 = inlined_call_operand.vmem [shape: f32[3,1,128], index: 6, kind: input, shape index: {}]   ;;  %s3077_s7 = inlined_call_operand.vmem [shape: f32[128,641], index: 7, kind: input, shape index: {}]   ;;  %s3078_s8 = inlined_call_operand.vmem [shape: s32[8,1], index: 8, kind: input, shape index: {}]   ;;  %s3079_s9 = inlined_call_operand.vmem [shape: s32[1,257], index: 9, kind: input, shape index: {}]   ;;  %s3080_s10 = inlined_call_operand.hbm [shape: f32[8,257], index: 10, kind: output, shape index: {0}]   ;;  %s3081_s11 = inlined_call_operand.hbm [shape: s8[8,257], index: 11, kind: output, shape index: {1}]  }
   0x1   :  { %v43_v0 = vld [vmem:[%s3070_s0] sm:$0xff]  ;;  %v44_v1 = vld [vmem:[%s3070_s0 + $0x8] sm:$0xff]  ;;  %v1287_v2 = vld [vmem:[%s3070_s0 + $0x10] sm:$0xff]  ;;  %1695 = vmatprep.subr.bf16.mxu0 %v2013_v7  ;;  %1719 = vmatprep.subr.bf16.mxu1 %v2013_v7 }
   0x2   :  { %v45_v3 = vadd.f32 %v44_v1, %v43_v0  ;;  %v1288_v4 = vld [vmem:[%s3070_s0 + $0x18] sm:$0xff]  ;;  %v1289_v5 = vld [vmem:[%s3070_s0 + $0x20] sm:$0xff]  ;;  %v1290_v6 = vld [vmem:[%s3070_s0 + $0x28] sm:$0xff] }
   0x3   :  { %v78_v8 = vadd.f32 %v1290_v6, %v1289_v5  ;;  %v1295_v9 = vld [vmem:[%s3070_s0 + $0x30] sm:$0xff]  ;;  %v1296_v10 = vld [vmem:[%s3070_s0 + $0x38] sm:$0xff]  ;;  %v65_v11 = vadd.f32 %v1288_v4, %v1287_v2  ;;  %v1298_v13 = vld [vmem:[%s3070_s0 + $0x40] sm:$0xff] }
   0x4   :  { %46 = vadd.xlane.f32.xlu0 %v45_v3  ;;  %v288_v12 = vadd.f32 %v1296_v10, %v1295_v9  ;;  %v1299_v14 = vld [vmem:[%s3070_s0 + $0x48] sm:$0xff]  ;;  %v1300_v15 = vld [vmem:[%s3070_s0 + $0x50] sm:$0xff]  ;;  %v1301_v16 = vld [vmem:[%s3070_s0 + $0x58] sm:$0xff] }
   0x5   :  { %79 = vadd.xlane.f32.xlu1 %v78_v8  ;;  %v88_v17 = vld [vmem:[%s3073_s3] sm:$0xff]  ;;  %v89_v18 = vld [vmem:[%s3073_s3 + $0x8] sm:$0xff]  ;;  %v90_v19 = vld [vmem:[%s3073_s3 + $0x10] sm:$0xff]  ;;  %v307_v20 = vadd.f32 %v1299_v14, %v1298_v13  ;;  %v320_v23 = vadd.f32 %v1301_v16, %v1300_v15 }
   0x6   :  { %v1696_v21 = vpack.c.bf16 %v89_v18, %v88_v17  ;;  %v91_v22 = vld [vmem:[%s3073_s3 + $0x18] sm:$0xff]  ;;  %v1340_v24 = vld [vmem:[%s3070_s0 + $0x60] sm:$0xff]  ;;  %v1341_v25 = vld [vmem:[%s3070_s0 + $0x68] sm:$0xff] }
   0x7   :  { %v1343_v26 = vld [vmem:[%s3070_s0 + $0x70] sm:$0xff]  ;;  %v1344_v27 = vld [vmem:[%s3070_s0 + $0x78] sm:$0xff]  ;;  %v1699_v28 = vpack.c.bf16 %v91_v22, %v90_v19 }
   0x8   :  { %66 = vadd.xlane.f32.xlu0 %v65_v11  ;;  %1697 = vmatpush3.bf16.msra.mxu0 %v1696_v21 }
   0x9   :  { %289 = vadd.xlane.f32.xlu1 %v288_v12 }
   0xa   :  { %18 = vsyncpa [#allocation5], 0  ;;  %1698 = vmatprep.subr.bf16.mxu0 %v2013_v7  ;;  %v92_v29 = vld [vmem:[%s3073_s3 + $0x20] sm:$0xff]  ;;  %v93_v30 = vld [vmem:[%s3073_s3 + $0x28] sm:$0xff]  ;;  %v534_v31 = vadd.f32 %v1341_v25, %v1340_v24  ;;  %v553_v32 = vadd.f32 %v1344_v27, %v1343_v26  ;;  %vm2014_vm0 = vmmov 0   ;;  %v2015_v48 = vmov 0.0  }
   0xb   :  { %v1345_v33 = vld [vmem:[%s3070_s0 + $0x80] sm:$0xff]  ;;  %v1346_v34 = vld [vmem:[%s3070_s0 + $0x88] sm:$0xff]  ;;  %v1702_v35 = vpack.c.bf16 %v93_v30, %v92_v29  ;;  %v94_v36 = vld [vmem:[%s3073_s3 + $0x30] sm:$0xff]  ;;  %1517 = vmatprep.mubr.msk.f32.mxu0 %vm2014_vm0, %v2015_v48  ;;  %1552 = vmatprep.mubr.msk.f32.mxu1 %vm2014_vm0, %v2015_v48  ;;  %v50_v11 = vlaneseq  ;;  %vm3083_vm1 = vcmask 7168  }
   0xc   :  { %308 = vadd.xlane.f32.xlu0 %v307_v20  ;;  %1700 = vmatpush3.bf16.msra.mxu0 %v1699_v28  ;;  %v95_v37 = vld [vmem:[%s3073_s3 + $0x38] sm:$0xff]  ;;  %v566_v38 = vadd.f32 %v1346_v34, %v1345_v33  ;;  %v96_v40 = vld [vmem:[%s3073_s3 + $0x40] sm:$0xff]  ;;  %v97_v41 = vld [vmem:[%s3073_s3 + $0x48] sm:$0xff] }
   0xd   :  { %321 = vadd.xlane.f32.xlu1 %v320_v23  ;;  %1701 = vmatprep.subr.bf16.mxu0 %v2013_v7  ;;  %v1705_v39 = vpack.c.bf16 %v95_v37, %v94_v36  ;;  %v1708_v42 = vpack.c.bf16 %v97_v41, %v96_v40  ;;  %v98_v43 = vld [vmem:[%s3073_s3 + $0x50] sm:$0xff]  ;;  %v99_v44 = vld [vmem:[%s3073_s3 + $0x58] sm:$0xff]  ;;  %v100_v46 = vld [vmem:[%s3073_s3 + $0x60] sm:$0xff]  ;;  %v51_v12 = vshrl.u32 %v50_v11, 7 }
   0xe   :  { %v1711_v45 = vpack.c.bf16 %v99_v44, %v98_v43  ;;  %v101_v47 = vld [vmem:[%s3073_s3 + $0x68] sm:$0xff]  ;;  %v102_v50 = vld [vmem:[%s3073_s3 + $0x70] sm:$0xff]  ;;  %v103_v51 = vld [vmem:[%s3073_s3 + $0x78] sm:$0xff] }
   0xf   :  { %v1714_v49 = vpack.c.bf16 %v101_v47, %v100_v46  ;;  %v1717_v52 = vpack.c.bf16 %v103_v51, %v102_v50  ;;  %v182_v53 = vld [vmem:[%s3075_s5] sm:$0xff]  ;;  %v183_v54 = vld [vmem:[%s3075_s5 + $0x8] sm:$0xff]  ;;  %v184_v55 = vld [vmem:[%s3075_s5 + $0x10] sm:$0xff]  ;;  %v2245_v13 = vsub.s32 0, %v51_v12  ;;  %v2251_v16 = vsub.s32 1, %v51_v12 }
  0x10   :  { %535 = vadd.xlane.f32.xlu0 %v534_v31  ;;  %1703 = vmatpush3.bf16.msra.mxu0 %v1702_v35  ;;  %v1720_v56 = vpack.c.bf16 %v183_v54, %v182_v53  ;;  %v185_v57 = vld [vmem:[%s3075_s5 + $0x18] sm:$0xff]  ;;  %v186_v59 = vld [vmem:[%s3075_s5 + $0x20] sm:$0xff]  ;;  %v187_v60 = vld [vmem:[%s3075_s5 + $0x28] sm:$0xff]  ;;  %v2253_v17 = vsub.s32 2, %v51_v12 }
  0x11   :  { %554 = vadd.xlane.f32.xlu1 %v553_v32  ;;  %1704 = vmatprep.subr.bf16.mxu0 %v2013_v7  ;;  %v1723_v58 = vpack.c.bf16 %v185_v57, %v184_v55  ;;  %v1726_v61 = vpack.c.bf16 %v187_v60, %v186_v59  ;;  %v188_v62 = vld [vmem:[%s3075_s5 + $0x30] sm:$0xff]  ;;  %v189_v63 = vld [vmem:[%s3075_s5 + $0x38] sm:$0xff]  ;;  %v190_v1 = vld [vmem:[%s3075_s5 + $0x40] sm:$0xff] }
  0x12   :  { %1721 = vmatpush3.bf16.msra.mxu1 %v1720_v56  ;;  %v1729_v0 = vpack.c.bf16 %v189_v63, %v188_v62  ;;  %v191_v2 = vld [vmem:[%s3075_s5 + $0x48] sm:$0xff]  ;;  %v192_v4 = vld [vmem:[%s3075_s5 + $0x50] sm:$0xff]  ;;  %v193_v5 = vld [vmem:[%s3075_s5 + $0x58] sm:$0xff] }
  0x13   :  { %1722 = vmatprep.subr.bf16.mxu1 %v2013_v7  ;;  %v1732_v3 = vpack.c.bf16 %v191_v2, %v190_v1  ;;  %v1735_v6 = vpack.c.bf16 %v193_v5, %v192_v4  ;;  %v194_v8 = vld [vmem:[%s3075_s5 + $0x60] sm:$0xff]  ;;  %v195_v9 = vld [vmem:[%s3075_s5 + $0x68] sm:$0xff]  ;;  %v1304_v36 = vld [vmem:[%s3073_s3 + $0x90] sm:$0xff] }
  0x14   :  { %567 = vadd.xlane.f32.xlu0 %v566_v38  ;;  %1706 = vmatpush3.bf16.msra.mxu0 %v1705_v39  ;;  %v1738_v10 = vpack.c.bf16 %v195_v9, %v194_v8  ;;  %v41_v14 = vld [vmem:[%s3071_s1] sm:$0x7]  ;;  %v1303_v32 = vld [vmem:[%s3073_s3 + $0x88] sm:$0xff]  ;;  %v1305_v37 = vld [vmem:[%s3073_s3 + $0x98] sm:$0xff] }
  0x15   :  { %1707 = vmatprep.subr.bf16.mxu0 %v2013_v7  ;;  %v53_v15 = vrot.slane %v41_v14, %v2245_v13  ;;  %v72_v22 = vrot.slane %v41_v14, %v2251_v16  ;;  %v85_v24 = vrot.slane %v41_v14, %v2253_v17  ;;  %v1286_v25 = vld [vmem:[%s3072_s2] ss:$0 sm:$0xff]  ;;  %v1747_v38 = vpack.c.bf16 %v1305_v37, %v1304_v36  ;;  %v1307_v40 = vld [vmem:[%s3073_s3 + $0xa8] sm:$0xff]  ;;  %v1309_v43 = vld [vmem:[%s3073_s3 + $0xb8] sm:$0xff] }
  0x16   :  { %1724 = vmatpush3.bf16.msra.mxu1 %v1723_v58  ;;  %v1302_v31 = vld [vmem:[%s3073_s3 + $0x80] sm:$0xff]  ;;  %v1312_v54 = vld [vmem:[%s3073_s3 + $0xd0] sm:$0xff]  ;;  %v1313_v55 = vld [vmem:[%s3073_s3 + $0xd8] sm:$0xff] }
  0x17   :  { %1725 = vmatprep.subr.bf16.mxu1 %v2013_v7  ;;  %v1744_v34 = vpack.c.bf16 %v1303_v32, %v1302_v31  ;;  %v1306_v39 = vld [vmem:[%s3073_s3 + $0xa0] sm:$0xff]  ;;  %v1759_v60 = vpack.c.bf16 %v1313_v55, %v1312_v54  ;;  %v1315_v63 = vld [vmem:[%s3073_s3 + $0xe8] sm:$0xff]  ;;  %v1316_v5 = vld [vmem:[%s3073_s3 + $0xf0] sm:$0xff] }
  0x18   :  { %1709 = vmatpush3.bf16.msra.mxu0 %v1708_v42  ;;  %v1750_v41 = vpack.c.bf16 %v1307_v40, %v1306_v39  ;;  %v1308_v42 = vld [vmem:[%s3073_s3 + $0xb0] sm:$0xff]  ;;  %v1310_v47 = vld [vmem:[%s3073_s3 + $0xc0] sm:$0xff]  ;;  %v1348_v14 = vld [vmem:[%s3073_s3 + $0x108] sm:$0xff] }
  0x19   :  { %1710 = vmatprep.subr.bf16.mxu0 %v2013_v7  ;;  %v1753_v44 = vpack.c.bf16 %v1309_v43, %v1308_v42  ;;  %v1297_v59 = vld [vmem:[%s3072_s2 + $0x1] ss:$0 sm:$0xff]  ;;  %v1356_v31 = vld [vmem:[%s3073_s3 + $0x148] sm:$0xff]  ;;  %v1357_v36 = vld [vmem:[%s3073_s3 + $0x150] sm:$0xff] }
  0x1a   :  { %1727 = vmatpush3.bf16.msra.mxu1 %v1726_v61  ;;  %v1314_v62 = vld [vmem:[%s3073_s3 + $0xe0] sm:$0xff]  ;;  %v1358_v37 = vld [vmem:[%s3073_s3 + $0x158] sm:$0xff] }
  0x1b   :  { %1728 = vmatprep.subr.bf16.mxu1 %v2013_v7  ;;  %v1762_v4 = vpack.c.bf16 %v1315_v63, %v1314_v62  ;;  %v1347_v12 = vld [vmem:[%s3073_s3 + $0x100] sm:$0xff]  ;;  %v1807_v42 = vpack.c.bf16 %v1358_v37, %v1357_v36  ;;  %v1321_v63 = vld [vmem:[%s3075_s5 + $0x88] sm:$0xff] }
  0x1c   :  { %1712 = vmatpush3.bf16.msra.mxu0 %v1711_v45  ;;  %v1293_v45 = vld [vmem:[%s3071_s1 + $0x4] sm:$0x7] }
  0x1d   :  { %1713 = vmatprep.subr.bf16.mxu0 %v2013_v7  ;;  %v295_v51 = vrot.slane %v1293_v45, %v2245_v13  ;;  %v314_v57 = vrot.slane %v1293_v45, %v2251_v16  ;;  %v1320_v62 = vld [vmem:[%s3075_s5 + $0x80] sm:$0xff] }
  0x1e   :  { %1730 = vmatpush3.bf16.msra.mxu1 %v1729_v0 }
  0x1f   :  { %1731 = vmatprep.subr.bf16.mxu1 %v2013_v7 }
  0x20   :  { %1715 = vmatpush3.bf16.msra.mxu0 %v1714_v49  ;;  %v1311_v49 = vld [vmem:[%s3073_s3 + $0xc8] sm:$0xff] }
  0x21   :  { %1716 = vmatprep.subr.bf16.mxu0 %v2013_v7 }
  0x22   :  { %1733 = vmatpush3.bf16.msra.mxu1 %v1732_v3  ;;  %v327_v3 = vrot.slane %v1293_v45, %v2253_v17  ;;  %v1360_v45 = vld [vmem:[%s3073_s3 + $0x168] sm:$0xff] }
  0x23   :  { %1734 = vmatprep.subr.bf16.mxu1 %v2013_v7 }
  0x24   :  { %1718 = vmatpush3.bf16.msra.mxu0 %v1717_v52  ;;  %v1756_v52 = vpack.c.bf16 %v1311_v49, %v1310_v47 }
  0x25   :  { %1743 = vmatprep.subr.bf16.mxu0 %v2013_v7 }
  0x26   :  { %1736 = vmatpush3.bf16.msra.mxu1 %v1735_v6  ;;  %v1317_v6 = vld [vmem:[%s3073_s3 + $0xf8] sm:$0xff] }
  0x27   :  { %1737 = vmatprep.subr.bf16.mxu1 %v2013_v7 }
  0x2a   :  { %1739 = vmatpush3.bf16.msra.mxu1 %v1738_v10  ;;  %v1765_v10 = vpack.c.bf16 %v1317_v6, %v1316_v5  ;;  %v1322_v5 = vld [vmem:[%s3075_s5 + $0x90] sm:$0xff]  ;;  %v1323_v6 = vld [vmem:[%s3075_s5 + $0x98] sm:$0xff] }
  0x2b   :  { %1740 = vmatprep.subr.bf16.mxu1 %v2013_v7 }
  0x91   :  { %v47_v18 = vpop.xlane.xlu0 %46 }
  0x92   :  { %v49_v19 = vmul.f32 0.00390625, %v47_v18  ;;  %v80_v20 = vpop.xlane.xlu1 %79  ;;  %v1792_v18 = vpack.c.bf16 %v1348_v14, %v1347_v12  ;;  %v1326_v14 = vld [vmem:[%s3075_s5 + $0xb0] sm:$0xff] }
  0x93   :  { %v81_v23 = vmul.f32 0.00390625, %v80_v20  ;;  %v1350_v20 = vld [vmem:[%s3073_s3 + $0x118] sm:$0xff] }
  0x94   :  { %v54_v21 = vmul.f32 %v53_v15, %v49_v19  ;;  %v1349_v19 = vld [vmem:[%s3073_s3 + $0x110] sm:$0xff] }
  0x95   :  { %v67_v26 = vpop.xlane.xlu0 %66  ;;  %v86_v30 = vmul.f32 %v85_v24, %v81_v23  ;;  %v1352_v23 = vld [vmem:[%s3073_s3 + $0x128] sm:$0xff] }
  0x96   :  { %v68_v27 = vmul.f32 0.00390625, %v67_v26  ;;  %v61_v28 = vadd.f32 %v1286_v25, %v54_v21  ;;  %v290_v46 = vpop.xlane.xlu1 %289  ;;  %v1795_v21 = vpack.c.bf16 %v1350_v20, %v1349_v19  ;;  %v1353_v25 = vld [vmem:[%s3073_s3 + $0x130] sm:$0xff]  ;;  %v1354_v26 = vld [vmem:[%s3073_s3 + $0x138] sm:$0xff]  ;;  %v1328_v19 = vld [vmem:[%s3075_s5 + $0xc0] sm:$0xff] }
  0x97   :  { %v291_v50 = vmul.f32 0.00390625, %v290_v46  ;;  %v1329_v20 = vld [vmem:[%s3075_s5 + $0xc8] sm:$0xff] }
  0x98   :  { %v73_v29 = vmul.f32 %v72_v22, %v68_v27  ;;  %v1351_v22 = vld [vmem:[%s3073_s3 + $0x120] sm:$0xff]  ;;  %v1801_v27 = vpack.c.bf16 %v1354_v26, %v1353_v25  ;;  %v1333_v26 = vld [vmem:[%s3075_s5 + $0xe8] sm:$0xff] }
  0x99   :  { %v309_v53 = vpop.xlane.xlu0 %308  ;;  %v296_v56 = vmul.f32 %v295_v51, %v291_v50  ;;  %v1798_v24 = vpack.c.bf16 %v1352_v23, %v1351_v22  ;;  %v1330_v22 = vld [vmem:[%s3075_s5 + $0xd0] sm:$0xff]  ;;  %v1331_v23 = vld [vmem:[%s3075_s5 + $0xd8] sm:$0xff]  ;;  %v1332_v25 = vld [vmem:[%s3075_s5 + $0xe0] sm:$0xff] }
  0x9a   :  { %v74_v33 = vadd.f32 %v73_v29, %v61_v28  ;;  %v310_v58 = vmul.f32 0.00390625, %v309_v53  ;;  %v322_v61 = vpop.xlane.xlu1 %321  ;;  %v1338_v28 = vld [vmem:[%s3071_s1 + $0x8] sm:$0x7]  ;;  %v1362_v53 = vld [vmem:[%s3073_s3 + $0x178] sm:$0xff] }
  0x9b   :  { %v303_v0 = vadd.f32 %v1297_v59, %v296_v56  ;;  %v323_v2 = vmul.f32 0.00390625, %v322_v61  ;;  %v541_v32 = vrot.slane %v1338_v28, %v2245_v13  ;;  %v560_v40 = vrot.slane %v1338_v28, %v2251_v16  ;;  %v197_v59 = vld [vmem:[%s3075_s5 + $0x78] sm:$0xff]  ;;  %v1291_v61 = vld [vmem:[%s3074_s4] ss:$0 sm:$0xff] }
  0x9c   :  { %v87_v35 = vadd.f32 %v86_v30, %v74_v33  ;;  %v315_v1 = vmul.f32 %v314_v57, %v310_v58  ;;  %v1355_v30 = vld [vmem:[%s3073_s3 + $0x140] sm:$0xff]  ;;  %v573_v49 = vrot.slane %v1338_v28, %v2253_v17  ;;  %v196_v58 = vld [vmem:[%s3075_s5 + $0x70] sm:$0xff] }
  0x9d   :  { %v328_v9 = vmul.f32 %v327_v3, %v323_v2  ;;  %v536_v29 = vpop.xlane.xlu0 %535  ;;  %v1768_v3 = vpack.c.bf16 %v1321_v63, %v1320_v62  ;;  %v1334_v28 = vld [vmem:[%s3075_s5 + $0xf0] sm:$0xff] }
  0x9e   :  { %1518 = vmatmul.mubr.f32.vlgmr.msra.gmra.mrb[0].mxu0 %v87_v35  ;;  %v316_v8 = vadd.f32 %v315_v1, %v303_v0  ;;  %v537_v33 = vmul.f32 0.00390625, %v536_v29  ;;  %v555_v35 = vpop.xlane.xlu1 %554  ;;  %v1335_v29 = vld [vmem:[%s3075_s5 + $0xf8] sm:$0xff] }
  0x9f   :  { %1745 = vmatpush3.bf16.msra.mxu0 %v1744_v34  ;;  %1587 = vmatprep.mubr.msk.f32.mxu0 %vm2014_vm0, %v2015_v48  ;;  %v1804_v34 = vpack.c.bf16 %v1356_v31, %v1355_v30  ;;  %v556_v39 = vmul.f32 0.00390625, %v555_v35  ;;  %v1319_v30 = vld [vmem:[%s3074_s4 + $0x1] ss:$0 sm:$0xff]  ;;  %v1789_v31 = vpack.c.bf16 %v1335_v29, %v1334_v28  ;;  %v798_v29 = vld [vmem:[%s3077_s7 + $0xc8] sm:$0xff] }
  0xa0   :  { %1746 = vmatprep.subr.bf16.mxu0 %v2013_v7  ;;  %v329_v15 = vadd.f32 %v328_v9, %v316_v8  ;;  %v1771_v8 = vpack.c.bf16 %v1323_v6, %v1322_v5  ;;  %v1324_v9 = vld [vmem:[%s3075_s5 + $0xa0] sm:$0xff]  ;;  %v782_v5 = vld [vmem:[%s3077_s7 + $0x48] sm:$0xff] }
  0xa1   :  { %v568_v43 = vpop.xlane.xlu0 %567  ;;  %v561_v47 = vmul.f32 %v560_v40, %v556_v39  ;;  %v1367_v39 = vld [vmem:[%s3075_s5 + $0x110] sm:$0xff]  ;;  %v1368_v40 = vld [vmem:[%s3075_s5 + $0x118] sm:$0xff]  ;;  %v773_v6 = vld [vmem:[%s3077_s7] sm:$0xff] }
  0xa2   :  { %v569_v50 = vmul.f32 0.00390625, %v568_v43  ;;  %v1370_v43 = vld [vmem:[%s3075_s5 + $0x128] sm:$0xff]  ;;  %v793_v28 = vld [vmem:[%s3077_s7 + $0xa0] sm:$0xff] }
  0xa3   :  { %1748 = vmatpush3.bf16.msra.mxu0 %v1747_v38  ;;  %v542_v38 = vmul.f32 %v541_v32, %v537_v33  ;;  %v1365_v32 = vld [vmem:[%s3075_s5 + $0x100] sm:$0xff]  ;;  %v1366_v33 = vld [vmem:[%s3075_s5 + $0x108] sm:$0xff] }
  0xa4   :  { %1749 = vmatprep.subr.bf16.mxu0 %v2013_v7  ;;  %v574_v55 = vmul.f32 %v573_v49, %v569_v50  ;;  %v1816_v37 = vpack.c.bf16 %v1366_v33, %v1365_v32  ;;  %v1373_v49 = vld [vmem:[%s3075_s5 + $0x140] sm:$0xff]  ;;  %v1374_v50 = vld [vmem:[%s3075_s5 + $0x148] sm:$0xff]  ;;  %v800_v33 = vld [vmem:[%s3077_s7 + $0xd8] sm:$0xff] }
  0xa7   :  { %1751 = vmatpush3.bf16.msra.mxu0 %v1750_v41  ;;  %v1342_v41 = vld [vmem:[%s3072_s2 + $0x2] ss:$0 sm:$0xff] }
  0xa8   :  { %1752 = vmatprep.subr.bf16.mxu0 %v2013_v7  ;;  %v549_v46 = vadd.f32 %v1342_v41, %v542_v38  ;;  %v1819_v41 = vpack.c.bf16 %v1368_v40, %v1367_v39  ;;  %v805_v39 = vld [vmem:[%s3077_s7 + $0x100] sm:$0xff] }
  0xaa   :  { %v562_v54 = vadd.f32 %v561_v47, %v549_v46  ;;  %v1372_v46 = vld [vmem:[%s3075_s5 + $0x138] sm:$0xff] }
  0xab   :  { %1754 = vmatpush3.bf16.msra.mxu0 %v1753_v44  ;;  %v1359_v44 = vld [vmem:[%s3073_s3 + $0x160] sm:$0xff] }
  0xac   :  { %1755 = vmatprep.subr.bf16.mxu0 %v2013_v7  ;;  %v1810_v51 = vpack.c.bf16 %v1360_v45, %v1359_v44  ;;  %v575_v57 = vadd.f32 %v574_v55, %v562_v54  ;;  %v1371_v45 = vld [vmem:[%s3075_s5 + $0x130] sm:$0xff]  ;;  %v1377_v55 = vld [vmem:[%s3075_s5 + $0x160] sm:$0xff] }
  0xad   :  { %v1825_v47 = vpack.c.bf16 %v1372_v46, %v1371_v45  ;;  %v818_v46 = vld [vmem:[%s3077_s7 + $0x168] sm:$0xff] }
  0xaf   :  { %1757 = vmatpush3.bf16.msra.mxu0 %v1756_v52  ;;  %v1361_v52 = vld [vmem:[%s3073_s3 + $0x170] sm:$0xff] }
  0xb0   :  { %1758 = vmatprep.subr.bf16.mxu0 %v2013_v7  ;;  %v1813_v56 = vpack.c.bf16 %v1362_v53, %v1361_v52  ;;  %v1375_v52 = vld [vmem:[%s3075_s5 + $0x150] sm:$0xff]  ;;  %v1376_v53 = vld [vmem:[%s3075_s5 + $0x158] sm:$0xff] }
  0xb1   :  { %v1831_v54 = vpack.c.bf16 %v1376_v53, %v1375_v52  ;;  %v817_v52 = vld [vmem:[%s3077_s7 + $0x160] sm:$0xff]  ;;  %v822_v53 = vld [vmem:[%s3077_s7 + $0x188] sm:$0xff] }
  0xb3   :  { %1760 = vmatpush3.bf16.msra.mxu0 %v1759_v60  ;;  %v1741_v60 = vpack.c.bf16 %v197_v59, %v196_v58  ;;  %v1379_v58 = vld [vmem:[%s3075_s5 + $0x170] sm:$0xff]  ;;  %v1380_v59 = vld [vmem:[%s3075_s5 + $0x178] sm:$0xff] }
  0xb4   :  { %1761 = vmatprep.subr.bf16.mxu0 %v2013_v7 }
  0xb5   :  { %1742 = vmatpush3.bf16.msra.mxu1 %v1741_v60  ;;  %v1364_v60 = vld [vmem:[%s3074_s4 + $0x2] ss:$0 sm:$0xff] }
  0xb6   :  { %1767 = vmatprep.subr.bf16.mxu1 %v2013_v7 }
  0xb7   :  { %1763 = vmatpush3.bf16.msra.mxu0 %v1762_v4 }
  0xb8   :  { %1764 = vmatprep.subr.bf16.mxu0 %v2013_v7 }
  0xbb   :  { %1766 = vmatpush3.bf16.msra.mxu0 %v1765_v10  ;;  %v1325_v10 = vld [vmem:[%s3075_s5 + $0xa8] sm:$0xff] }
  0xbc   :  { %1791 = vmatprep.subr.bf16.mxu0 %v2013_v7  ;;  %v1774_v12 = vpack.c.bf16 %v1325_v10, %v1324_v9 }
  0xbe   :  { %1588 = vmatmul.mubr.f32.vlgmr.msra.gmra.mrb[2].mxu0 %v329_v15  ;;  %v1327_v15 = vld [vmem:[%s3075_s5 + $0xb8] sm:$0xff] }
  0xbf   :  { %1793 = vmatpush3.bf16.msra.mxu0 %v1792_v18  ;;  %1657 = vmatprep.mubr.msk.f32.mxu0 %vm2014_vm0, %v2015_v48  ;;  %v1777_v18 = vpack.c.bf16 %v1327_v15, %v1326_v14  ;;  %v781_v14 = vld [vmem:[%s3077_s7 + $0x40] sm:$0xff]  ;;  %v786_v15 = vld [vmem:[%s3077_s7 + $0x68] sm:$0xff] }
  0xc0   :  { %1794 = vmatprep.subr.bf16.mxu0 %v2013_v7 }
  0xc3   :  { %1796 = vmatpush3.bf16.msra.mxu0 %v1795_v21  ;;  %v1780_v21 = vpack.c.bf16 %v1329_v20, %v1328_v19  ;;  %v792_v19 = vld [vmem:[%s3077_s7 + $0x98] sm:$0xff] }
  0xc4   :  { %1797 = vmatprep.subr.bf16.mxu0 %v2013_v7  ;;  %v788_v20 = vld [vmem:[%s3077_s7 + $0x78] sm:$0xff] }
  0xc7   :  { %1799 = vmatpush3.bf16.msra.mxu0 %v1798_v24  ;;  %v1783_v24 = vpack.c.bf16 %v1331_v23, %v1330_v22  ;;  %v1843_v22 = vpack.c.bf16 %v792_v19, %v786_v15  ;;  %v833_v15 = vld [vmem:[%s3077_s7 + $0x1e0] sm:$0xff] }
  0xc8   :  { %1800 = vmatprep.subr.bf16.mxu0 %v2013_v7 }
  0xcb   :  { %1802 = vmatpush3.bf16.msra.mxu0 %v1801_v27  ;;  %v1786_v27 = vpack.c.bf16 %v1333_v26, %v1332_v25  ;;  %v791_v25 = vld [vmem:[%s3077_s7 + $0x90] sm:$0xff] }
  0xcc   :  { %1803 = vmatprep.subr.bf16.mxu0 %v2013_v7  ;;  %v787_v26 = vld [vmem:[%s3077_s7 + $0x70] sm:$0xff] }
  0xcf   :  { %1805 = vmatpush3.bf16.msra.mxu0 %v1804_v34 }
  0xd0   :  { %1806 = vmatprep.subr.bf16.mxu0 %v2013_v7 }
  0xd3   :  { %1808 = vmatpush3.bf16.msra.mxu0 %v1807_v42  ;;  %v1369_v42 = vld [vmem:[%s3075_s5 + $0x120] sm:$0xff] }
  0xd4   :  { %1809 = vmatprep.subr.bf16.mxu0 %v2013_v7  ;;  %v1822_v44 = vpack.c.bf16 %v1370_v43, %v1369_v42  ;;  %v816_v42 = vld [vmem:[%s3077_s7 + $0x158] sm:$0xff] }
  0xd5   :  { %v812_v43 = vld [vmem:[%s3077_s7 + $0x138] sm:$0xff] }
  0xd7   :  { %1811 = vmatpush3.bf16.msra.mxu0 %v1810_v51  ;;  %v1828_v51 = vpack.c.bf16 %v1374_v50, %v1373_v49  ;;  %v815_v49 = vld [vmem:[%s3077_s7 + $0x150] sm:$0xff]  ;;  %v1883_v50 = vpack.c.bf16 %v818_v46, %v812_v43 }
  0xd8   :  { %1812 = vmatprep.subr.bf16.mxu0 %v2013_v7  ;;  %v863_v43 = vld [vmem:[%s3077_s7 + $0x2d0] sm:$0xff] }
  0xdb   :  { %1814 = vmatpush3.bf16.msra.mxu0 %v1813_v56  ;;  %v1378_v56 = vld [vmem:[%s3075_s5 + $0x168] sm:$0xff] }
  0xde   :  { %1658 = vmatmul.mubr.f32.vlgmr.msra.gmra.mrb[4].mxu0 %v575_v57  ;;  %v1834_v57 = vpack.c.bf16 %v1378_v56, %v1377_v55 }
  0xdf   :  { %933 = vmatprep.mubr.f32.mxu0 %v2015_v48 }
 0x171   :  { %v177_v0 = vpop.f32.mrb[0].mxu0 }
 0x172   :  { %v178_v1 = vadd.f32 %v1291_v61, %v177_v0  ;;  %v1519_v2 = vpop.f32.mrb[1].mxu0  ;;  %v1837_v61 = vpack.c.bf16 %v1380_v59, %v1379_v58  ;;  %v1292_v58 = vld [vmem:[%s3076_s6] ss:$0 sm:$0xff] }
 0x173   :  { %v774_v2 = vld [vmem:[%s3077_s7 + $0x8] sm:$0xff] }
 0x174   :  { %v181_v4 = vmax.f32 %v178_v1, 0.0 }
 0x176   :  { %1553 = vmatmul.mubr.f32.vlgmr.msra.gmra.mrb[0].mxu1 %v181_v4 }
 0x177   :  { %1769 = vmatpush3.bf16.msra.mxu1 %v1768_v3  ;;  %1622 = vmatprep.mubr.msk.f32.mxu1 %vm2014_vm0, %v2015_v48  ;;  %v780_v3 = vld [vmem:[%s3077_s7 + $0x38] sm:$0xff] }
 0x178   :  { %1770 = vmatprep.subr.bf16.mxu1 %v2013_v7  ;;  %v1839_v4 = vpack.c.bf16 %v780_v3, %v774_v2  ;;  %v821_v2 = vld [vmem:[%s3077_s7 + $0x180] sm:$0xff]  ;;  %v827_v3 = vld [vmem:[%s3077_s7 + $0x1b0] sm:$0xff] }
 0x17a   :  { %1840 = vmatprep.subr.bf16.mxu0 %v1839_v4  ;;  %v1857_v4 = vpack.c.bf16 %v827_v3, %v821_v2  ;;  %v790_v2 = vld [vmem:[%s3077_s7 + $0x88] sm:$0xff]  ;;  %v796_v3 = vld [vmem:[%s3077_s7 + $0xb8] sm:$0xff] }
 0x17b   :  { %1772 = vmatpush3.bf16.msra.mxu1 %v1771_v8  ;;  %v779_v8 = vld [vmem:[%s3077_s7 + $0x30] sm:$0xff] }
 0x17c   :  { %1773 = vmatprep.subr.bf16.mxu1 %v2013_v7  ;;  %v1841_v10 = vpack.c.bf16 %v779_v8, %v773_v6  ;;  %v834_v8 = vld [vmem:[%s3077_s7 + $0x1e8] sm:$0xff] }
 0x17e   :  { %1842 = vmatpush1.bf16.msra.mxu0 %v1841_v10  ;;  %v836_v10 = vld [vmem:[%s3077_s7 + $0x1f8] sm:$0xff] }
 0x17f   :  { %1775 = vmatpush3.bf16.msra.mxu1 %v1774_v12  ;;  %v775_v12 = vld [vmem:[%s3077_s7 + $0x10] sm:$0xff]  ;;  %1844 = vmatprep.subr.bf16.mxu0 %v1843_v22  ;;  %v841_v22 = vld [vmem:[%s3077_s7 + $0x220] sm:$0xff] }
 0x180   :  { %1776 = vmatprep.subr.bf16.mxu1 %v2013_v7 }
 0x183   :  { %1778 = vmatpush3.bf16.msra.mxu1 %v1777_v18  ;;  %v1873_v18 = vpack.c.bf16 %v781_v14, %v775_v12  ;;  %v842_v14 = vld [vmem:[%s3077_s7 + $0x228] sm:$0xff] }
 0x184   :  { %1779 = vmatprep.subr.bf16.mxu1 %v2013_v7  ;;  %v1891_v19 = vpack.c.bf16 %v842_v14, %v836_v10  ;;  %v802_v10 = vld [vmem:[%s3077_s7 + $0xe8] sm:$0xff] }
 0x187   :  { %1781 = vmatpush3.bf16.msra.mxu1 %v1780_v21  ;;  %v794_v21 = vld [vmem:[%s3077_s7 + $0xa8] sm:$0xff] }
 0x188   :  { %1782 = vmatprep.subr.bf16.mxu1 %v2013_v7  ;;  %v1875_v23 = vpack.c.bf16 %v794_v21, %v788_v20  ;;  %v835_v21 = vld [vmem:[%s3077_s7 + $0x1f0] sm:$0xff] }
 0x18b   :  { %1784 = vmatpush3.bf16.msra.mxu1 %v1783_v24  ;;  %v785_v24 = vld [vmem:[%s3077_s7 + $0x60] sm:$0xff] }
 0x18c   :  { %1785 = vmatprep.subr.bf16.mxu1 %v2013_v7 }
 0x18f   :  { %1787 = vmatpush3.bf16.msra.mxu1 %v1786_v27  ;;  %v1845_v27 = vpack.c.bf16 %v791_v25, %v785_v24  ;;  %v1893_v24 = vpack.c.bf16 %v841_v22, %v835_v21  ;;  %v852_v25 = vld [vmem:[%s3077_s7 + $0x278] sm:$0xff] }
 0x190   :  { %1788 = vmatprep.subr.bf16.mxu1 %v2013_v7 }
 0x191   :  { %v421_v34 = vpop.f32.mrb[2].mxu0  ;;  %1846 = vmatpush1.bf16.msra.mxu0 %v1845_v27  ;;  %v854_v27 = vld [vmem:[%s3077_s7 + $0x288] sm:$0xff] }
 0x192   :  { %v422_v35 = vadd.f32 %v1319_v30, %v421_v34  ;;  %v1589_v36 = vpop.f32.mrb[3].mxu0  ;;  %v804_v30 = vld [vmem:[%s3077_s7 + $0xf8] sm:$0xff]  ;;  %v806_v34 = vld [vmem:[%s3077_s7 + $0x108] sm:$0xff] }
 0x193   :  { %1790 = vmatpush3.bf16.msra.mxu1 %v1789_v31  ;;  %v1877_v31 = vpack.c.bf16 %v793_v28, %v787_v26  ;;  %v1847_v32 = vpack.c.bf16 %v804_v30, %v798_v29  ;;  %v1879_v36 = vpack.c.bf16 %v806_v34, %v800_v33  ;;  %v848_v26 = vld [vmem:[%s3077_s7 + $0x258] sm:$0xff]  ;;  %v845_v30 = vld [vmem:[%s3077_s7 + $0x240] sm:$0xff] }
 0x194   :  { %v425_v38 = vmax.f32 %v422_v35, 0.0  ;;  %1815 = vmatprep.subr.bf16.mxu1 %v2013_v7  ;;  %v797_v35 = vld [vmem:[%s3077_s7 + $0xc0] sm:$0xff]  ;;  %v1895_v29 = vpack.c.bf16 %v854_v27, %v848_v26  ;;  %v832_v26 = vld [vmem:[%s3077_s7 + $0x1d8] sm:$0xff] }
 0x195   :  { %1848 = vmatprep.subr.bf16.mxu0 %v1847_v32  ;;  %v847_v32 = vld [vmem:[%s3077_s7 + $0x250] sm:$0xff]  ;;  %v853_v34 = vld [vmem:[%s3077_s7 + $0x280] sm:$0xff] }
 0x196   :  { %1623 = vmatmul.mubr.f32.vlgmr.msra.gmra.mrb[2].mxu1 %v425_v38  ;;  %v799_v38 = vld [vmem:[%s3077_s7 + $0xd0] sm:$0xff] }
 0x197   :  { %1817 = vmatpush3.bf16.msra.mxu1 %v1816_v37  ;;  %1692 = vmatprep.mubr.msk.f32.mxu1 %vm2014_vm0, %v2015_v48  ;;  %v803_v37 = vld [vmem:[%s3077_s7 + $0xf0] sm:$0xff] }
 0x198   :  { %1818 = vmatprep.subr.bf16.mxu1 %v2013_v7  ;;  %v1849_v40 = vpack.c.bf16 %v803_v37, %v797_v35  ;;  %v858_v35 = vld [vmem:[%s3077_s7 + $0x2a8] sm:$0xff]  ;;  %v1897_v37 = vpack.c.bf16 %v853_v34, %v847_v32  ;;  %v844_v32 = vld [vmem:[%s3077_s7 + $0x238] sm:$0xff] }
 0x19a   :  { %1850 = vmatpush1.bf16.msra.mxu0 %v1849_v40  ;;  %v866_v40 = vld [vmem:[%s3077_s7 + $0x2e8] sm:$0xff] }
 0x19b   :  { %1820 = vmatpush3.bf16.msra.mxu1 %v1819_v41  ;;  %v810_v41 = vld [vmem:[%s3077_s7 + $0x128] sm:$0xff] }
 0x19c   :  { %1821 = vmatprep.subr.bf16.mxu1 %v2013_v7  ;;  %v1851_v45 = vpack.c.bf16 %v816_v42, %v810_v41  ;;  %v857_v41 = vld [vmem:[%s3077_s7 + $0x2a0] sm:$0xff] }
 0x19d   :  { %v1869_v46 = vpack.c.bf16 %v863_v43, %v857_v41  ;;  %v849_v41 = vld [vmem:[%s3077_s7 + $0x260] sm:$0xff]  ;;  %v862_v43 = vld [vmem:[%s3077_s7 + $0x2c8] sm:$0xff] }
 0x19e   :  { %1852 = vmatprep.subr.bf16.mxu0 %v1851_v45  ;;  %v865_v45 = vld [vmem:[%s3077_s7 + $0x2e0] sm:$0xff] }
 0x19f   :  { %1823 = vmatpush3.bf16.msra.mxu1 %v1822_v44  ;;  %v1881_v44 = vpack.c.bf16 %v805_v39, %v799_v38  ;;  %v860_v39 = vld [vmem:[%s3077_s7 + $0x2b8] sm:$0xff] }
 0x1a0   :  { %1824 = vmatprep.subr.bf16.mxu1 %v2013_v7  ;;  %v1899_v42 = vpack.c.bf16 %v866_v40, %v860_v39 }
 0x1a3   :  { %1826 = vmatpush3.bf16.msra.mxu1 %v1825_v47  ;;  %v809_v47 = vld [vmem:[%s3077_s7 + $0x120] sm:$0xff] }
 0x1a4   :  { %1827 = vmatprep.subr.bf16.mxu1 %v2013_v7  ;;  %v1853_v55 = vpack.c.bf16 %v815_v49, %v809_v47 }
 0x1a6   :  { %1854 = vmatpush1.bf16.msra.mxu0 %v1853_v55 }
 0x1a7   :  { %1829 = vmatpush3.bf16.msra.mxu1 %v1828_v51  ;;  %v811_v51 = vld [vmem:[%s3077_s7 + $0x130] sm:$0xff] }
 0x1a8   :  { %1830 = vmatprep.subr.bf16.mxu1 %v2013_v7  ;;  %v1885_v56 = vpack.c.bf16 %v817_v52, %v811_v51  ;;  %v778_v51 = vld [vmem:[%s3077_s7 + $0x28] sm:$0xff]  ;;  %v784_v52 = vld [vmem:[%s3077_s7 + $0x58] sm:$0xff] }
 0x1ab   :  { %1832 = vmatpush3.bf16.msra.mxu1 %v1831_v54  ;;  %v828_v54 = vld [vmem:[%s3077_s7 + $0x1b8] sm:$0xff] }
 0x1ac   :  { %1833 = vmatprep.subr.bf16.mxu1 %v2013_v7 }
 0x1af   :  { %1835 = vmatpush3.bf16.msra.mxu1 %v1834_v57  ;;  %v1855_v57 = vpack.c.bf16 %v828_v54, %v822_v53  ;;  %v1903_v53 = vpack.c.bf16 %v784_v52, %v778_v51  ;;  %v1382_v54 = vld [vmem:[%s3076_s6 + $0x2] ss:$0 sm:$0xff] }
 0x1b0   :  { %1836 = vmatprep.subr.bf16.mxu1 %v2013_v7  ;;  %v776_v7 = vld [vmem:[%s3077_s7 + $0x18] sm:$0xff] }
 0x1b1   :  { %v667_v62 = vpop.f32.mrb[4].mxu0  ;;  %v1871_v9 = vpack.c.bf16 %v782_v5, %v776_v7  ;;  %1856 = vmatprep.subr.bf16.mxu0 %v1855_v57  ;;  %v823_v7 = vld [vmem:[%s3077_s7 + $0x190] sm:$0xff]  ;;  %v829_v5 = vld [vmem:[%s3077_s7 + $0x1c0] sm:$0xff] }
 0x1b2   :  { %v668_v63 = vadd.f32 %v1364_v60, %v667_v62  ;;  %v1659_v0 = vpop.f32.mrb[5].mxu0  ;;  %v1889_v6 = vpack.c.bf16 %v829_v5, %v823_v7  ;;  %1858 = vmatpush1.bf16.msra.mxu0 %v1857_v4 }
 0x1b3   :  { %1838 = vmatpush3.bf16.msra.mxu1 %v1837_v61  ;;  %v830_v0 = vld [vmem:[%s3077_s7 + $0x1c8] sm:$0xff] }
 0x1b4   :  { %v671_v1 = vmax.f32 %v668_v63, 0.0  ;;  %1872 = vmatprep.subr.bf16.mxu1 %v1871_v9  ;;  %v824_v63 = vld [vmem:[%s3077_s7 + $0x198] sm:$0xff] }
 0x1b5   :  { %v840_v9 = vld [vmem:[%s3077_s7 + $0x218] sm:$0xff] }
 0x1b6   :  { %1693 = vmatmul.mubr.f32.vlgmr.msra.gmra.mrb[4].mxu1 %v671_v1  ;;  %v1887_v1 = vpack.c.bf16 %v830_v0, %v824_v63  ;;  %v1859_v12 = vpack.c.bf16 %v840_v9, %v834_v8  ;;  %v777_v0 = vld [vmem:[%s3077_s7 + $0x20] sm:$0xff]  ;;  %v795_v9 = vld [vmem:[%s3077_s7 + $0xb0] sm:$0xff] }
 0x1b7   :  { %1008 = vmatprep.mubr.f32.mxu1 %v2015_v48  ;;  %1874 = vmatpush1.bf16.msra.mxu1 %v1873_v18  ;;  %v839_v18 = vld [vmem:[%s3077_s7 + $0x210] sm:$0xff]  ;;  %v789_v8 = vld [vmem:[%s3077_s7 + $0x80] sm:$0xff] }
 0x1b8   :  { %1876 = vmatprep.subr.bf16.mxu1 %v1875_v23  ;;  %v1861_v20 = vpack.c.bf16 %v839_v18, %v833_v15  ;;  %v846_v23 = vld [vmem:[%s3077_s7 + $0x248] sm:$0xff]  ;;  %1860 = vmatprep.subr.bf16.mxu0 %v1859_v12  ;;  %v808_v12 = vld [vmem:[%s3077_s7 + $0x118] sm:$0xff]  ;;  %v801_v15 = vld [vmem:[%s3077_s7 + $0xe0] sm:$0xff] }
 0x1b9   :  { %v1863_v28 = vpack.c.bf16 %v852_v25, %v846_v23  ;;  %v1911_v14 = vpack.c.bf16 %v808_v12, %v802_v10  ;;  %v807_v18 = vld [vmem:[%s3077_s7 + $0x110] sm:$0xff]  ;;  %v813_v23 = vld [vmem:[%s3077_s7 + $0x140] sm:$0xff]  ;;  %v826_v25 = vld [vmem:[%s3077_s7 + $0x1a8] sm:$0xff] }
 0x1ba   :  { %1862 = vmatpush1.bf16.msra.mxu0 %v1861_v20  ;;  %v820_v20 = vld [vmem:[%s3077_s7 + $0x178] sm:$0xff]  ;;  %v1913_v21 = vpack.c.bf16 %v807_v18, %v801_v15 }
 0x1bb   :  { %1878 = vmatpush1.bf16.msra.mxu1 %v1877_v31  ;;  %v851_v31 = vld [vmem:[%s3077_s7 + $0x270] sm:$0xff]  ;;  %1864 = vmatprep.subr.bf16.mxu0 %v1863_v28  ;;  %v1919_v28 = vpack.c.bf16 %v832_v26, %v826_v25 }
 0x1bc   :  { %1880 = vmatprep.subr.bf16.mxu1 %v1879_v36  ;;  %v1865_v33 = vpack.c.bf16 %v851_v31, %v845_v30  ;;  %v864_v36 = vld [vmem:[%s3077_s7 + $0x2d8] sm:$0xff]  ;;  %v831_v30 = vld [vmem:[%s3077_s7 + $0x1d0] sm:$0xff]  ;;  %v838_v31 = vld [vmem:[%s3077_s7 + $0x208] sm:$0xff] }
 0x1bd   :  { %v1867_v38 = vpack.c.bf16 %v864_v36, %v858_v35  ;;  %v1923_v34 = vpack.c.bf16 %v844_v32, %v838_v31  ;;  %v837_v35 = vld [vmem:[%s3077_s7 + $0x200] sm:$0xff]  ;;  %v843_v36 = vld [vmem:[%s3077_s7 + $0x230] sm:$0xff] }
 0x1be   :  { %1866 = vmatpush1.bf16.msra.mxu0 %v1865_v33  ;;  %v1925_v39 = vpack.c.bf16 %v843_v36, %v837_v35 }
 0x1bf   :  { %1882 = vmatpush1.bf16.msra.mxu1 %v1881_v44  ;;  %v859_v44 = vld [vmem:[%s3077_s7 + $0x2b0] sm:$0xff]  ;;  %1868 = vmatprep.subr.bf16.mxu0 %v1867_v38  ;;  %v856_v38 = vld [vmem:[%s3077_s7 + $0x298] sm:$0xff] }
 0x1c0   :  { %1884 = vmatprep.subr.bf16.mxu1 %v1883_v50  ;;  %v1901_v47 = vpack.c.bf16 %v865_v45, %v859_v44  ;;  %v868_v44 = vld [vmem:[%s3077_s7 + $0x2f8] sm:$0xff] }
 0x1c2   :  { %1870 = vmatpush1.bf16.msra.mxu0 %v1869_v46  ;;  %v1931_v46 = vpack.c.bf16 %v868_v44, %v862_v43 }
 0x1c3   :  { %1886 = vmatpush1.bf16.msra.mxu1 %v1885_v56  ;;  %1904 = vmatprep.subr.bf16.mxu0 %v1903_v53 }
 0x1c4   :  { %1888 = vmatprep.subr.bf16.mxu1 %v1887_v1  ;;  %v783_v1 = vld [vmem:[%s3077_s7 + $0x50] sm:$0xff] }
 0x1c5   :  { %v1905_v4 = vpack.c.bf16 %v783_v1, %v777_v0 }
 0x1c7   :  { %1890 = vmatpush1.bf16.msra.mxu1 %v1889_v6  ;;  %v1907_v6 = vpack.c.bf16 %v796_v3, %v790_v2 }
 0x1c8   :  { %1892 = vmatprep.subr.bf16.mxu1 %v1891_v19  ;;  %v814_v19 = vld [vmem:[%s3077_s7 + $0x148] sm:$0xff] }
 0x1c9   :  { %v1915_v22 = vpack.c.bf16 %v820_v20, %v814_v19 }
 0x1cb   :  { %1894 = vmatpush1.bf16.msra.mxu1 %v1893_v24  ;;  %v819_v24 = vld [vmem:[%s3077_s7 + $0x170] sm:$0xff] }
 0x1cc   :  { %1896 = vmatprep.subr.bf16.mxu1 %v1895_v29  ;;  %v1917_v27 = vpack.c.bf16 %v819_v24, %v813_v23  ;;  %v825_v29 = vld [vmem:[%s3077_s7 + $0x1a0] sm:$0xff] }
 0x1cd   :  { %v1921_v33 = vpack.c.bf16 %v831_v30, %v825_v29 }
 0x1cf   :  { %1898 = vmatpush1.bf16.msra.mxu1 %v1897_v37  ;;  %v850_v37 = vld [vmem:[%s3077_s7 + $0x268] sm:$0xff] }
 0x1d0   :  { %1900 = vmatprep.subr.bf16.mxu1 %v1899_v42  ;;  %v1927_v40 = vpack.c.bf16 %v856_v38, %v850_v37  ;;  %v855_v42 = vld [vmem:[%s3077_s7 + $0x290] sm:$0xff] }
 0x1d1   :  { %v1929_v45 = vpack.c.bf16 %v855_v42, %v849_v41 }
 0x1d3   :  { %1902 = vmatpush1.bf16.msra.mxu1 %v1901_v47  ;;  %v861_v47 = vld [vmem:[%s3077_s7 + $0x2c0] sm:$0xff] }
 0x1d4   :  { %1935 = vmatprep.subr.bf16.mxu1 %v1903_v53 }
 0x249   :  { %v271_v59 = vpop.f32.mrb[0].mxu1 }
 0x24a   :  { %v2631_v60 = vadd.f32 %v1292_v58, %v271_v59  ;;  %v1554_v61 = vpop.f32.mrb[1].mxu1  ;;  %v1114_v59 = vld [vmem:[%s3078_s8] sm:$0xff] }
 0x24b   :  { %v2016_v61 = vmov 0  }
 0x24c   :  { %v275_v62 = vmul.f32 %v2631_v60, %v2631_v60  ;;  %1957 = vset.pattern.permute.xlu1 %v2016_v61  ;;  %1958 = vset.pattern.permute.xlu0 %v2016_v61 }
 0x24e   :  { %276 = vadd.xlane.f32.xlu1 %v275_v62 }
 0x25f   :  { %1117 = vperm.xlu1 %1957, %v1114_v59  }
 0x269   :  { %v2725_v49 = vpop.f32.mrb[2].mxu1 }
 0x26a   :  { %v1624_v50 = vpop.f32.mrb[3].mxu1 }
 0x26b   :  { %v867_v50 = vld [vmem:[%s3077_s7 + $0x2f0] sm:$0xff] }
 0x26c   :  { %v1933_v51 = vpack.c.bf16 %v867_v50, %v861_v47 }
 0x289   :  { %v763_v55 = vpop.f32.mrb[4].mxu1 }
 0x28a   :  { %v2736_v56 = vadd.f32 %v1382_v54, %v763_v55  ;;  %v1694_v57 = vpop.f32.mrb[5].mxu1 }
 0x28c   :  { %v767_v58 = vmul.f32 %v2736_v56, %v2736_v56 }
 0x28e   :  { %768 = vadd.xlane.f32.xlu0 %v767_v58 }
 0x2db   :  { %v277_v62 = vpop.xlane.xlu1 %276 }
 0x2dc   :  { %v278_v63 = vmax.f32 %v277_v62, 1e-24 }
 0x2de   :  { %1959 = vrsqrt.f32 %v278_v63 }
 0x2df   :  { %v1118_v2 = vpop.permute.xlu1 %1117 }
 0x2e8   :  { %v1960_v7 = vpop.eup %1959 }
 0x2e9   :  { %v2758_v5 = vmul.f32 %v1960_v7, %v2631_v60  ;;  %v1909_v60 = vpack.c.bf16 %v795_v9, %v789_v8 }
 0x2eb   :  { %934 = vmatmul.mubr.f32.vlgmr.msra.gmra.mrb[6].mxu0 %v2758_v5  ;;  %1009 = vmatmul.mubr.f32.vlgmr.msra.gmra.mrb[6].mxu1 %v2758_v5 }
 0x2ec   :  { %1906 = vmatpush1.bf16.msra.mxu0 %v1905_v4  ;;  %1943 = vmatpush1.bf16.msra.mxu1 %v1905_v4 }
 0x2ed   :  { %1908 = vmatprep.subr.bf16.mxu0 %v1907_v6  ;;  %1936 = vmatprep.subr.bf16.mxu1 %v1907_v6 }
 0x2ee   :  { %939 = vmatprep.mubr.f32.mxu0 %v2015_v48  ;;  %1013 = vmatprep.mubr.f32.mxu1 %v2015_v48 }
 0x2f0   :  { %1910 = vmatpush1.bf16.msra.mxu0 %v1909_v60  ;;  %1944 = vmatpush1.bf16.msra.mxu1 %v1909_v60 }
 0x2f1   :  { %1912 = vmatprep.subr.bf16.mxu0 %v1911_v14  ;;  %1937 = vmatprep.subr.bf16.mxu1 %v1911_v14 }
 0x2f4   :  { %1914 = vmatpush1.bf16.msra.mxu0 %v1913_v21  ;;  %1945 = vmatpush1.bf16.msra.mxu1 %v1913_v21 }
 0x2f5   :  { %1916 = vmatprep.subr.bf16.mxu0 %v1915_v22  ;;  %1938 = vmatprep.subr.bf16.mxu1 %v1915_v22 }
 0x2f8   :  { %1918 = vmatpush1.bf16.msra.mxu0 %v1917_v27  ;;  %1946 = vmatpush1.bf16.msra.mxu1 %v1917_v27 }
 0x2f9   :  { %1920 = vmatprep.subr.bf16.mxu0 %v1919_v28  ;;  %1939 = vmatprep.subr.bf16.mxu1 %v1919_v28 }
 0x2fc   :  { %1922 = vmatpush1.bf16.msra.mxu0 %v1921_v33  ;;  %1947 = vmatpush1.bf16.msra.mxu1 %v1921_v33 }
 0x2fd   :  { %1924 = vmatprep.subr.bf16.mxu0 %v1923_v34  ;;  %1940 = vmatprep.subr.bf16.mxu1 %v1923_v34  ;;  %v1337_v34 = vld [vmem:[%s3076_s6 + $0x1] ss:$0 sm:$0xff]  ;;  %s2017_s6 = smov [#allocation2]  }
 0x2fe   :  { %v518_v41 = vadd.f32 %v1337_v34, %v2725_v49  ;;  %s1264_s0 = sshll.u32 %s2017_s6, 4  ;;  %s1265_s0 = int_to_ptr.vmem [resolvable:$true] %s1264_s0 }
 0x2ff   :  { %s1965_s12 = scalar_lea.vmem %s1265_s0, 384  ;;  %p1970_p1 = scmp.lt.s32.totalorder %s1265_s0, %s1265_s0 }
 0x300   :  { %1926 = vmatpush1.bf16.msra.mxu0 %v1925_v39  ;;  %1948 = vmatpush1.bf16.msra.mxu1 %v1925_v39  ;;  %v521_v44 = vmul.f32 %v518_v41, %v518_v41  ;;  %p1966_p0 = scmp.ne.s32.totalorder %s1265_s0, %s1965_s12  ;;  %p1971_p2 = scmp.lt.s32.totalorder %s1965_s12, %s1965_s12 }
 0x301   :  { %1928 = vmatprep.subr.bf16.mxu0 %v1927_v40  ;;  %1941 = vmatprep.subr.bf16.mxu1 %v1927_v40 }
 0x302   :  { %p1972_p3 = por %p1971_p2, %p1970_p1 }
 0x304   :  { %1930 = vmatpush1.bf16.msra.mxu0 %v1929_v45  ;;  %1949 = vmatpush1.bf16.msra.mxu1 %v1929_v45  ;;  %p1973_p4 = pnand %p1972_p3, %p1966_p0 }
 0x305   :  { %1932 = vmatprep.subr.bf16.mxu0 %v1931_v46  ;;  %1942 = vmatprep.subr.bf16.mxu1 %v1931_v46 }
 0x308   :  { %1934 = vmatpush1.bf16.msra.mxu0 %v1933_v51  ;;  %1950 = vmatpush1.bf16.msra.mxu1 %v1933_v51 }
 0x31b   :  { %v769_v52 = vpop.xlane.xlu0 %768 }
 0x31c   :  { %v770_v53 = vmax.f32 %v769_v52, 1e-24 }
 0x31e   :  { %1961 = vrsqrt.f32 %v770_v53 }
 0x328   :  { %v1962_v54 = vpop.eup %1961 }
 0x329   :  { %v772_v55 = vmul.f32 %v1962_v54, %v2736_v56  ;;  %v1115_v56 = vld [vmem:[%s3079_s9] sm:$0x7] }
 0x32a   :  { %v1122_v1 = vrot.slane %v1115_v56, %v2245_v13  ;;  %v1126_v3 = vrot.slane %v1115_v56, %v2251_v16  ;;  %v1130_v9 = vrot.slane %v1115_v56, %v2253_v17 }
 0x32b   :  { %940 = vmatmul.mubr.f32.gmra.mrb[8].mxu0 %v772_v55  ;;  %1014 = vmatmul.mubr.f32.gmra.mrb[8].mxu1 %v772_v55 }
 0x32c   :  { %1083 = vmatprep.mubr.f32.mxu0 %v2015_v48  ;;  %1087 = vmatprep.mubr.f32.mxu1 %v2015_v48  ;;  %v2853_v48 = vand.u32 127, %v50_v11  ;;  %vm1131_vm3 = vcmp.eq.s32.totalorder %v1118_v2, %v1122_v1  ;;  %vm2865_vm5 = vcmp.eq.s32.totalorder %v1118_v2, %v1126_v3  ;;  %vm2873_vm6 = vcmp.eq.s32.totalorder %v1118_v2, %v1130_v9 }
 0x32e   :  { %vm3082_vm2 = vcmp.eq.s32.totalorder %v2853_v48, 0 }
 0x32f   :  { %1084 = vmatmul.mubr.f32.vlgmr.msra.gmra.mrb[10].mxu0 %v2758_v5  ;;  %1088 = vmatmul.mubr.f32.vlgmr.msra.gmra.mrb[10].mxu1 %v772_v55  ;;  %vm2861_vm4 = vmor %vm3082_vm2, %vm1131_vm3 }
 0x3be   :  { %v2846_v57 = vpop.f32.mrb[6].mxu0  ;;  %v1010_v58 = vpop.f32.mrb[6].mxu1 }
 0x3bf   :  { %v1109_v59 = vmul.f32 14.285714, %v1010_v58  ;;  %v937_v62 = vpop.f32.mrb[7].mxu0  ;;  %v1012_v63 = vpop.f32.mrb[7].mxu1 }
 0x3c0   :  { %v1108_v0 = vmul.f32 14.285714, %v937_v62 }
 0x3c1   :  { %1113 = vst.msk [vmem:[#allocation2 + $0x10] sm:$0xff] %vm3083_vm1, %v1109_v59 }
 0x3c2   :  { %1111 = vst [vmem:[#allocation2 + $0x8] sm:$0xff] %v1108_v0 }
 0x3fe   :  { %v941_v7 = vpop.f32.mrb[8].mxu0  ;;  %v1015_v4 = vpop.f32.mrb[8].mxu1 }
 0x3ff   :  { %v942_v6 = vpop.f32.mrb[9].mxu0  ;;  %v1016_v8 = vpop.f32.mrb[9].mxu1 }
 0x400   :  { %v1137_v12 = vsel %vm2861_vm4, -3.0, %v1016_v8 }
 0x402   :  { %v1085_v13 = vpop.f32.mrb[10].mxu0  ;;  %v1089_v16 = vpop.f32.mrb[10].mxu1 }
 0x403   :  { %v1138_v60 = vsel %vm2865_vm5, -3.0, %v1089_v16  ;;  %v1086_v14 = vpop.f32.mrb[11].mxu0  ;;  %v1091_v17 = vpop.f32.mrb[11].mxu1 }
 0x404   :  { %v1141_v18 = vmax.f32 %v1137_v12, %v1138_v60  ;;  %v1139_v19 = vsel %vm2873_vm6, -3.0, %v1091_v17 }
 0x405   :  { %v1140_v20 = vsel %vm3083_vm1, %v1139_v19, -inf }
 0x406   :  { %v1142_v21 = vmax.f32 %v1141_v18, %v1140_v20 }
 0x408   :  { %1143 = vmax.xlane.f32.xlu0 %v1142_v21 }
 0x495   :  { %v1144_v22 = vpop.xlane.xlu0 %1143 }
 0x496   :  { %vm1145_vm7 = vcmp.eq.f32.partialorder %v1137_v12, %v1144_v22  ;;  %vm1146_vm8 = vcmp.eq.f32.partialorder %v1138_v60, %v1144_v22  ;;  %vm1147_vm9 = vcmp.eq.f32.partialorder %v1139_v19, %v1144_v22  ;;  %vm1148_vm10 = vcmp.gt.f32.partialorder %v1144_v22, -3.0 }
 0x497   :  { %vm2880_vm11 = vmand %vm1145_vm7, %vm1148_vm10 }
 0x498   :  { %vm2884_vm12 = vmand %vm1146_vm8, %vm1148_vm10  ;;  %v1157_v25 = vsel %vm2880_vm11, -3.0, %v1137_v12 }
 0x499   :  { %vm2890_vm13 = vmand %vm1147_vm9, %vm1148_vm10  ;;  %v1158_v27 = vsel %vm2884_vm12, -3.0, %v1138_v60 }
 0x49a   :  { %v1159_v28 = vsel %vm2890_vm13, -3.0, %v1139_v19  ;;  %v1161_v29 = vmax.f32 %v1157_v25, %v1158_v27  ;;  %vm1156_vm15 = vmor %vm2873_vm6, %vm2890_vm13 }
 0x49b   :  { %v1160_v30 = vsel %vm3083_vm1, %v1159_v28, -inf  ;;  %vm1154_vm0 = vmor %vm2861_vm4, %vm2880_vm11 }
 0x49c   :  { %v1162_v31 = vmax.f32 %v1161_v29, %v1160_v30  ;;  %vm3098_vm13 = vmor %vm2865_vm5, %vm2884_vm12 }
 0x49e   :  { %1163 = vmax.xlane.f32.xlu0 %v1162_v31 }
 0x52b   :  { %v1164_v32 = vpop.xlane.xlu0 %1163 }
 0x52c   :  { %vm1165_vm3 = vcmp.eq.f32.partialorder %v1157_v25, %v1164_v32  ;;  %vm1166_vm7 = vcmp.eq.f32.partialorder %v1158_v27, %v1164_v32  ;;  %vm1167_vm8 = vcmp.eq.f32.partialorder %v1159_v28, %v1164_v32  ;;  %vm1168_vm9 = vcmp.gt.f32.partialorder %v1164_v32, -3.0 }
 0x52d   :  { %vm1171_vm10 = vmand %vm1165_vm3, %vm1168_vm9 }
 0x52e   :  { %vm1172_vm2 = vmand %vm1166_vm7, %vm1168_vm9  ;;  %v1177_v33 = vsel %vm1171_vm10, -3.0, %v1157_v25 }
 0x52f   :  { %vm1173_vm14 = vmand %vm1167_vm8, %vm1168_vm9  ;;  %v1178_v35 = vsel %vm1172_vm2, -3.0, %v1158_v27 }
 0x530   :  { %vm2914_vm6 = vmor %vm1156_vm15, %vm1173_vm14  ;;  %v1179_v37 = vsel %vm1173_vm14, -3.0, %v1159_v28  ;;  %v1181_v38 = vmax.f32 %v1177_v33, %v1178_v35 }
 0x531   :  { %v1180_v39 = vsel %vm3083_vm1, %v1179_v37, -inf  ;;  %vm2924_vm3 = vmor %vm3098_vm13, %vm1172_vm2 }
 0x532   :  { %v1182_v42 = vmax.f32 %v1181_v38, %v1180_v39  ;;  %vm2934_vm14 = vmor %vm1154_vm0, %vm1171_vm10 }
 0x534   :  { %1183 = vmax.xlane.f32.xlu0 %v1182_v42 }
 0x538   :  { %522 = vadd.xlane.f32.xlu0 %v521_v44 }
 0x5c1   :  { %v1184_v45 = vpop.xlane.xlu0 %1183 }
 0x5c2   :  { %vm1185_vm2 = vcmp.eq.f32.partialorder %v1177_v33, %v1184_v45  ;;  %vm1186_vm5 = vcmp.eq.f32.partialorder %v1178_v35, %v1184_v45  ;;  %vm1187_vm12 = vcmp.eq.f32.partialorder %v1179_v37, %v1184_v45  ;;  %vm1188_vm15 = vcmp.gt.f32.partialorder %v1184_v45, -3.0 }
 0x5c3   :  { %vm2938_vm7 = vmand %vm1185_vm2, %vm1188_vm15 }
 0x5c4   :  { %vm2942_vm8 = vmand %vm1186_vm5, %vm1188_vm15  ;;  %v1197_v47 = vsel %vm2938_vm7, -3.0, %v1177_v33 }
 0x5c5   :  { %vm2948_vm4 = vmand %vm1187_vm12, %vm1188_vm15  ;;  %v1198_v51 = vsel %vm2942_vm8, -3.0, %v1178_v35  ;;  %v523_v58 = vpop.xlane.xlu0 %522 }
 0x5c6   :  { %v1199_v52 = vsel %vm2948_vm4, -3.0, %v1179_v37  ;;  %v1201_v53 = vmax.f32 %v1197_v47, %v1198_v51  ;;  %vm1195_vm11 = vmor %vm2924_vm3, %vm2942_vm8  ;;  %v524_v59 = vmax.f32 %v523_v58, 1e-24 }
 0x5c7   :  { %v1200_v54 = vsel %vm3083_vm1, %v1199_v52, -inf  ;;  %vm1194_vm0 = vmor %vm2934_vm14, %vm2938_vm7 }
 0x5c8   :  { %v1202_v55 = vmax.f32 %v1201_v53, %v1200_v54  ;;  %1963 = vrsqrt.f32 %v524_v59  ;;  %vm3113_vm14 = vmor %vm2914_vm6, %vm2948_vm4 }
 0x5ca   :  { %1203 = vmax.xlane.f32.xlu1 %v1202_v55 }
 0x5d2   :  { %v1964_v3 = vpop.eup %1963 }
 0x5d3   :  { %v526_v9 = vmul.f32 %v1964_v3, %v518_v41 }
 0x5d5   :  { %v1098_v10 = vmul.f32 %v526_v9, %v2758_v5 }
 0x657   :  { %v1204_v62 = vpop.xlane.xlu1 %1203 }
 0x658   :  { %vm1205_vm10 = vcmp.eq.f32.partialorder %v1197_v47, %v1204_v62  ;;  %vm1206_vm13 = vcmp.eq.f32.partialorder %v1198_v51, %v1204_v62  ;;  %vm1208_vm2 = vcmp.gt.f32.partialorder %v1204_v62, -3.0  ;;  %vm1207_vm12 = vcmp.eq.f32.partialorder %v1199_v52, %v1204_v62 }
 0x659   :  { %vm1211_vm5 = vmand %vm1205_vm10, %vm1208_vm2 }
 0x65a   :  { %vm1212_vm15 = vmand %vm1206_vm13, %vm1208_vm2  ;;  %v1217_v63 = vsel %vm1211_vm5, -3.0, %v1197_v47 }
 0x65b   :  { %vm2974_vm1 = vmor %vm1194_vm0, %vm1211_vm5  ;;  %v1218_v56 = vsel %vm1212_vm15, -3.0, %v1198_v51  ;;  %vm3116_vm0 = vcmask 7168  }
 0x65c   :  { %vm2983_vm9 = vmor %vm1195_vm11, %vm1212_vm15  ;;  %v1221_v2 = vmax.f32 %v1217_v63, %v1218_v56 }
 0x65d   :  { %vm1213_vm10 = vmand %vm1207_vm12, %vm1208_vm2  ;;  %vm3121_vm12 = vcmp.eq.s32.totalorder %v2853_v48, 0 }
 0x65e   :  { %vm2992_vm7 = vmor %vm3113_vm14, %vm1213_vm10  ;;  %v1219_v4 = vsel %vm1213_vm10, -3.0, %v1199_v52 }
 0x65f   :  { %v1220_v6 = vsel %vm3116_vm0, %v1219_v4, -inf }
 0x660   :  { %v1222_v8 = vmax.f32 %v1221_v2, %v1220_v6 }
 0x662   :  { %1223 = vmax.xlane.f32.xlu0 %v1222_v8 }
 0x666   :  { %1099 = vadd.xlane.f32.xlu0 %v1098_v10 }
 0x6ef   :  { %v1224_v11 = vpop.xlane.xlu0 %1223 }
 0x6f0   :  { %vm1225_vm3 = vcmp.eq.f32.partialorder %v1217_v63, %v1224_v11  ;;  %vm1226_vm8 = vcmp.eq.f32.partialorder %v1218_v56, %v1224_v11  ;;  %vm1227_vm11 = vcmp.eq.f32.partialorder %v1219_v4, %v1224_v11  ;;  %vm1228_vm13 = vcmp.gt.f32.partialorder %v1224_v11, -3.0 }
 0x6f1   :  { %vm1231_vm2 = vmand %vm1225_vm3, %vm1228_vm13 }
 0x6f2   :  { %vm2998_vm6 = vmand %vm1226_vm8, %vm1228_vm13 }
 0x6f3   :  { %vm3002_vm4 = vmand %vm1227_vm11, %vm1228_vm13  ;;  %v1100_v12 = vpop.xlane.xlu0 %1099 }
 0x6f4   :  { %vm1234_vm5 = vmor %vm2974_vm1, %vm1231_vm2  ;;  %v1104_v5 = vsel %vm3121_vm12, %v1100_v12, %v2846_v57 }
 0x6f5   :  { %vm1235_vm15 = vmor %vm2983_vm9, %vm2998_vm6  ;;  %v1107_v60 = vmul.f32 14.285714, %v1104_v5 }
 0x6f6   :  { %vm1236_vm10 = vmor %vm2992_vm7, %vm3002_vm4 }
 0x6f7   :  { %vm3019_vm14 = vmpackc.low %vm1234_vm5, %vm1234_vm5  ;;  %1110 = vst [vmem:[#allocation2] sm:$0xff] %v1107_v60 }
 0x6f8   :  { %vm1238_vm1 = vmpackc.even %vm3019_vm14, %vm3019_vm14 }
 0x6f9   :  { %1976 = shalt.err (!%p1973_p4)
}
 0x6fa   :  { %s1977_s14 = scalar_lea.hbm %s3080_s10, 384 }
 0x6fb   :  { %p1978_p5 = scmp.ne.s32.totalorder %s3080_s10, %s1977_s14  ;;  %p1981_p6 = scmp.lt.u32.totalorder %s1977_s14, %s3080_s10 }
 0x6fd   :  { %p1983_p7 = pnand %p1981_p6, %p1978_p5 }
 0x6ff   :  { %1986 = shalt.err (!%p1983_p7)
}
 0x700   :  { %1267 = dma.vmem_to_hbm [thread:$0]  %s1265_s0, 384, %s3080_s10, [#allocation3]   ;;  %vm1239_vm0 = vmpackc.low %vm1235_vm15, %vm1235_vm15  ;;  %v1243_v57 = vsel %vm1238_vm1, 16843009, %v2016_v61  ;;  %vm1252_vm9 = vcmask 1041408   ;;  %vm1253_vm11 = vcmask 1043458  }
 0x701   :  { %vm1240_vm3 = vmpackc.even %vm1239_vm0, %vm1239_vm0  ;;  %v1246_v48 = vunpack.c.0.s8 %v1243_v57  ;;  %vm1255_vm6 = vcmask 5124   ;;  %s2018_s10 = smov [#allocation4]  }
 0x702   :  { %vm1241_vm8 = vmpackc.low %vm1236_vm10, %vm1236_vm10  ;;  %v1244_v17 = vsel %vm1240_vm3, 16843009, %v2016_v61  ;;  %s1274_s18 = sshll.u32 %s2018_s10, 4  ;;  %s1275_s18 = int_to_ptr.vmem [resolvable:$true] %s1274_s18 }
 0x703   :  { %vm1242_vm13 = vmpackc.even %vm1241_vm8, %vm1241_vm8  ;;  %v1247_v15 = vunpack.c.0.s8 %v1244_v17  ;;  %s1987_s19 = scalar_lea.vmem %s1275_s18, 96  ;;  %p1992_p9 = scmp.lt.s32.totalorder %s1275_s18, %s1275_s18 }
 0x704   :  { %v1245_v18 = vsel %vm1242_vm13, 16843009, %v2016_v61  ;;  %vm1254_vm2 = vmor %vm1253_vm11, %vm1252_vm9  ;;  %p1988_p8 = scmp.ne.s32.totalorder %s1275_s18, %s1987_s19  ;;  %p1993_p10 = scmp.lt.s32.totalorder %s1987_s19, %s1987_s19 }
 0x705   :  { %v1248_v19 = vunpack.c.0.s8 %v1245_v18  ;;  %v1249_v20 = vpack.c.b16 %v1247_v15, %v1246_v48  ;;  %vm1256_vm5 = vmor %vm1255_vm6, %vm1254_vm2 }
 0x706   :  { %p1994_p11 = por %p1993_p10, %p1992_p9 }
 0x707   :  { %v1250_v21 = vpack.c.b16 %v1248_v19, %v1248_v19 }
 0x708   :  { %p1995_p12 = pnand %p1994_p11, %p1988_p8 }
 0x709   :  { %v1251_v22 = vpack.c.b8 %v1250_v21, %v1249_v20 }
 0x70b   :  { %1257 = vst.msk [vmem:[#allocation4] sm:$0x3f] %vm1256_vm5, %v1251_v22 }
 0x70c   :  { %1998 = shalt.err (!%p1995_p12)
}
 0x70d   :  { %s1999_s22 = scalar_lea.hbm %s3081_s11, 96 }
 0x70e   :  { %p2000_p13 = scmp.ne.s32.totalorder %s3081_s11, %s1999_s22  ;;  %p2003_p0 = scmp.lt.u32.totalorder %s1999_s22, %s3081_s11 }
 0x710   :  { %p2005_p1 = pnand %p2003_p0, %p2000_p13 }
 0x712   :  { %2008 = shalt.err (!%p2005_p1)
}
 0x713   :  { %1277 = dma.vmem_to_hbm [thread:$0]  %s1275_s18, 96, %s3081_s11, [#allocation5]  }
 0x714   :  { %2009 = dma.done.wait [#allocation3], 384  }
 0x715   :  { %2010 = vsyncadd [#allocation3], 4294966912 }
 0x716   :  { %2011 = dma.done.wait [#allocation5], 96  }
 0x717   :  { %2012 = vsyncadd [#allocation5], 4294967200 }
 0x718   :  { %1284 = vsyncpa [#allocation3], 1 }
 0x719   :  { %1285 = vsyncpa [#allocation5], 1 }

</bundles_post_ra>
